<compile_context>
chip_gen: v7x
topology: tpu7x:2x2x1
jax: 0.10.0
libtpu: 0.0.40
codegen_flags: <defaults>
</compile_context>

<pallas_src>
import functools
import math

import jax
import jax.numpy as jnp
from jax.experimental import pallas as pl
from jax.experimental.pallas import tpu as pltpu


# ----------------------------- Kernel 1: fused QKV projection ----------------------------- #
def _qkv_proj_kernel(x_ref, w_ref, b_ref, q_ref, k_ref, v_ref):
    # x_ref: (1, tt, C)       | w_ref: (C, 3C) bf16 packed q|k|v (q cols pre-scaled by 1/sqrt(D))
    # b_ref: (1, 3C) f32      | q/k/v_ref: (1, tt, C) bf16 (channel-minor, head split deferred)
    C = q_ref.shape[-1]
    x = x_ref[0].astype(jnp.bfloat16)
    qkv = jnp.dot(x, w_ref[...], preferred_element_type=jnp.float32) + b_ref[0]
    qkv = qkv.astype(q_ref.dtype)
    q_ref[0] = qkv[:, :C]
    k_ref[0] = qkv[:, C:2 * C]
    v_ref[0] = qkv[:, 2 * C:]


# --------------------- Kernel 2: flash attention + fused output projection ----------------- #
def _split_heads(x2d, n_head, d_head):
    # (t, C) -> (H, t, D) via static lane slices + leading-dim stack (avoids a minor-dim
    # reshape; slices and leading-dim concat are safely lowered by Mosaic).
    return jnp.stack([x2d[:, h * d_head:(h + 1) * d_head] for h in range(n_head)], axis=0)


def _flash_attn_kernel(n_head, d_head, q_ref, k_ref, v_ref, wp_ref, bp_ref, o_ref,
                       m_sc, l_sc, acc_sc, qt_sc):
    ki = pl.program_id(2)

    @pl.when(ki == 0)
    def _init():
        m_sc[...] = jnp.full(m_sc.shape, -jnp.inf, dtype=m_sc.dtype)
        l_sc[...] = jnp.zeros(l_sc.shape, dtype=l_sc.dtype)
        acc_sc[...] = jnp.zeros(acc_sc.shape, dtype=acc_sc.dtype)
        # Q block is constant across the kv axis: split heads once and cache in VMEM.
        qt_sc[...] = _split_heads(q_ref[0], n_head, d_head)

    k = _split_heads(k_ref[0], n_head, d_head)          # (H, tk, D) bf16
    v = _split_heads(v_ref[0], n_head, d_head)          # (H, tk, D) bf16

    # Head-batched MXU matmuls (bf16 in, f32 accumulate); softmax stats stay in f32 (VPU/EUP).
    # Q already carries the 1/sqrt(D) scale (folded into the projection weights).
    s = jnp.einsum("hqd,hkd->hqk", qt_sc[...], k,
                   preferred_element_type=jnp.float32)                   # (H, tq, tk) f32
    m_prev = m_sc[...]
    m_new = jnp.maximum(m_prev, s.max(axis=-1, keepdims=True))           # (H, tq, 1)
    alpha = jnp.exp(m_prev - m_new)
    p = jnp.exp(s - m_new)
    l_sc[...] = alpha * l_sc[...] + p.sum(axis=-1, keepdims=True)
    acc_sc[...] = alpha * acc_sc[...] + jnp.einsum(
        "hqk,hkd->hqd", p.astype(v.dtype), v, preferred_element_type=jnp.float32)
    m_sc[...] = m_new

    @pl.when(ki == pl.num_programs(2) - 1)
    def _finalize():
        inv_l = pl.reciprocal(l_sc[...], approx=True)                    # EUP slot
        y = acc_sc[...] * inv_l                                          # (H, tq, D) f32
        # Merge heads back to channel-minor with one lane concat (== .transpose(1,2).view()),
        # then fuse the output projection: a single (tq, C) x (C, C) MXU pass.
        y_cat = jnp.concatenate([y[h] for h in range(n_head)], axis=-1)  # (tq, C) f32
        out = jnp.dot(y_cat.astype(jnp.bfloat16), wp_ref[...],
                      preferred_element_type=jnp.float32) + bp_ref[0]
        o_ref[0] = out.astype(o_ref.dtype)


# --------------------------------------- Wrapper ------------------------------------------ #
def _seq_tile(T):
    # Prefer 256-wide tiles (fills the 256x256 MXU on v6e/v7x and halves K/V HBM re-reads),
    # fall back to 128, else one full-sequence tile (small or non-divisible T).
    # TODO(synk): ragged/padded T needs a kv mask (zero-padded K/V would corrupt the softmax).
    for t in (256, 128):
        if T % t == 0:
            return t
    return T


def _vmem_limit_bytes():
    # ~75% of physical VMEM: ~96 MiB on v5e/v6e (128 MiB physical), ~48 MiB on v7x (64 MiB).
    try:
        cap = int(pltpu.get_tpu_info().vmem_capacity_bytes)
    except Exception:
        cap = 128 * 1024 * 1024
    return max(32 * 1024 * 1024, min(cap * 3 // 4, 96 * 1024 * 1024))


def _weight_spec(block_shape, index_map):
    # Grid-invariant weights/biases: single-buffer them (default double-buffering wastes VMEM;
    # at large C it can blow v7x's 64 MiB). Fall back gracefully if pipeline_mode is unavailable.
    try:
        return pl.BlockSpec(block_shape, index_map, pipeline_mode=pl.Buffered(1))
    except (AttributeError, TypeError):
        return pl.BlockSpec(block_shape, index_map)


def self_attention_pallas(x, params, n_head):
    """x: (B, T, C). params follow the PyTorch nn.Linear convention (W is (out, in))."""
    B, T, C = x.shape
    assert C % n_head == 0
    D = C // n_head
    scale = 1.0 / math.sqrt(D)

    tt = _seq_tile(T)          # kernel-1 row tile
    tq = tk = _seq_tile(T)     # kernel-2 flash tiles
    vmem_limit = _vmem_limit_bytes()

    # Pack + pre-transpose projection weights ONCE in the wrapper (bf16 MXU inputs).
    # The 1/sqrt(D) softmax scale is folded into the query projection (free).
    w_qkv_t = jnp.concatenate(
        [params["wq"] * scale, params["wk"], params["wv"]], axis=0).T.astype(jnp.bfloat16)
    b_qkv = jnp.concatenate(
        [params["bq"] * scale, params["bk"], params["bv"]]).reshape(1, 3 * C).astype(jnp.float32)
    wp_t = params["wp"].T.astype(jnp.bfloat16)                                   # (C, C)
    bp = params["bp"].reshape(1, C).astype(jnp.float32)

    # ---- Kernel 1: fused QKV projection -> three channel-minor (B, T, C) bf16 arrays ------- #
    # TODO(synk): for very large C (>~2K) tile the 3C output-column axis so the packed weight
    # does not have to stay VMEM-resident (v7x only has 64 MiB of VMEM).
    ce_qkv = pl.CostEstimate(
        flops=2 * B * T * C * 3 * C,
        transcendentals=0,
        bytes_accessed=int(B * T * C * x.dtype.itemsize
                           + C * 3 * C * 2 + 3 * C * 4 + 3 * B * T * C * 2))
    q, k, v = pl.pallas_call(
        _qkv_proj_kernel,
        out_shape=[jax.ShapeDtypeStruct((B, T, C), jnp.bfloat16) for _ in range(3)],
        grid_spec=pltpu.PrefetchScalarGridSpec(
            num_scalar_prefetch=0,
            grid=(B, T // tt),
            in_specs=[pl.BlockSpec((1, tt, C), lambda b, i: (b, i, 0)),
                      _weight_spec((C, 3 * C), lambda b, i: (0, 0)),
                      _weight_spec((1, 3 * C), lambda b, i: (0, 0))],
            out_specs=[pl.BlockSpec((1, tt, C), lambda b, i: (b, i, 0)) for _ in range(3)],
        ),
        compiler_params=pltpu.CompilerParams(
            dimension_semantics=("parallel", "parallel"),
            vmem_limit_bytes=vmem_limit),
        cost_estimate=ce_qkv,
    )(x, w_qkv_t, b_qkv)

    # ---- Kernel 2: flash attention + fused output projection ------------------------------- #
    # TODO(synk): if B * (T // tq) == 1, add heads as a leading parallel grid axis so v7x's
    # second TensorCore gets work.
    out_itemsize = jnp.dtype(x.dtype).itemsize
    ce_attn = pl.CostEstimate(
        flops=4 * B * T * T * C + 2 * B * T * C * C,
        transcendentals=B * n_head * T * T,
        bytes_accessed=int(B * T * C * 2                     # Q, read once per q tile
                           + 2 * (T // tq) * B * T * C * 2   # K and V, re-read once per q tile
                           + C * C * 2 + C * 4 + B * T * C * out_itemsize))
    out = pl.pallas_call(
        functools.partial(_flash_attn_kernel, n_head, D),
        out_shape=jax.ShapeDtypeStruct((B, T, C), x.dtype),
        grid_spec=pltpu.PrefetchScalarGridSpec(
            num_scalar_prefetch=0,
            grid=(B, T // tq, T // tk),              # (parallel, parallel, reduction-last)
            in_specs=[pl.BlockSpec((1, tq, C), lambda b, qi, ki: (b, qi, 0)),
                      pl.BlockSpec((1, tk, C), lambda b, qi, ki: (b, ki, 0)),
                      pl.BlockSpec((1, tk, C), lambda b, qi, ki: (b, ki, 0)),
                      _weight_spec((C, C), lambda b, qi, ki: (0, 0)),
                      _weight_spec((1, C), lambda b, qi, ki: (0, 0))],
            out_specs=pl.BlockSpec((1, tq, C), lambda b, qi, ki: (b, qi, 0)),
            scratch_shapes=[pltpu.VMEM((n_head, tq, 1), jnp.float32),   # running max
                            pltpu.VMEM((n_head, tq, 1), jnp.float32),   # running sum
                            pltpu.VMEM((n_head, tq, D), jnp.float32),   # output accumulator
                            pltpu.VMEM((n_head, tq, D), jnp.bfloat16)], # head-split Q cache
        ),
        compiler_params=pltpu.CompilerParams(
            dimension_semantics=("parallel", "parallel", "arbitrary"),
            vmem_limit_bytes=vmem_limit),
        cost_estimate=ce_attn,
    )(q, k, v, wp_t, bp)
    return out


def self_attention_ref(x, params, n_head):
    """Pure-JAX f32 reference matching the PyTorch forward (dropout = identity)."""
    B, T, C = x.shape
    D = C // n_head

    def lin(t, w, b):
        return t @ w.T + b

    q = lin(x, params["wq"], params["bq"]).reshape(B, T, n_head, D).transpose(0, 2, 1, 3)
    k = lin(x, params["wk"], params["bk"]).reshape(B, T, n_head, D).transpose(0, 2, 1, 3)
    v = lin(x, params["wv"], params["bv"]).reshape(B, T, n_head, D).transpose(0, 2, 1, 3)
    att = jnp.einsum("bhqd,bhkd->bhqk", q, k) * (1.0 / math.sqrt(D))
    att = jax.nn.softmax(att, axis=-1)
    y = jnp.einsum("bhqk,bhkd->bhqd", att, v)
    y = y.transpose(0, 2, 1, 3).reshape(B, T, C)
    return lin(y, params["wp"], params["bp"])


if __name__ == "__main__":
    B, T, C, n_head = 2, 8, 32, 4

    key = jax.random.PRNGKey(0)
    keys = jax.random.split(key, 9)
    bound = 1.0 / math.sqrt(C)  # mimic nn.Linear default uniform init scale
    params = {
        "wq": jax.random.uniform(keys[0], (C, C), jnp.float32, -bound, bound),
        "bq": jax.random.uniform(keys[1], (C,), jnp.float32, -bound, bound),
        "wk": jax.random.uniform(keys[2], (C, C), jnp.float32, -bound, bound),
        "bk": jax.random.uniform(keys[3], (C,), jnp.float32, -bound, bound),
        "wv": jax.random.uniform(keys[4], (C, C), jnp.float32, -bound, bound),
        "bv": jax.random.uniform(keys[5], (C,), jnp.float32, -bound, bound),
        "wp": jax.random.uniform(keys[6], (C, C), jnp.float32, -bound, bound),
        "bp": jax.random.uniform(keys[7], (C,), jnp.float32, -bound, bound),
    }
    x = jax.random.normal(keys[8], (B, T, C), jnp.float32)

    attn_fn = jax.jit(functools.partial(self_attention_pallas, n_head=n_head))
    out = jax.block_until_ready(attn_fn(x, params))
    ref = jax.block_until_ready(self_attention_ref(x, params, n_head))

    assert out.shape == (B, T, C)
    # bf16 MXU inputs with f32 accumulation -> compare against the f32 reference loosely.
    max_err = float(jnp.max(jnp.abs(out - ref)))
    assert max_err < 5e-2, f"Pallas output mismatch vs reference (max err {max_err})"
    print("KERNEL_OK")
</pallas_src>

<mosaic_0001>
module attributes {stable_mosaic.version = 11 : i64} {
  func.func @_flash_attn_kernel(%arg0: i32, %arg1: i32, %arg2: i32, %arg3: memref<1x8x32xbf16, #tpu.memory_space<vmem>>, %arg4: memref<1x8x32xbf16, #tpu.memory_space<vmem>>, %arg5: memref<1x8x32xbf16, #tpu.memory_space<vmem>>, %arg6: memref<32x32xbf16, #tpu.memory_space<vmem>>, %arg7: memref<1x32xf32, #tpu.memory_space<vmem>>, %arg8: memref<1x8x32xf32, #tpu.memory_space<vmem>>, %arg9: memref<4x8x1xf32, #tpu.memory_space<vmem>>, %arg10: memref<4x8x1xf32, #tpu.memory_space<vmem>>, %arg11: memref<4x8x8xf32, #tpu.memory_space<vmem>>, %arg12: memref<4x8x8xbf16, #tpu.memory_space<vmem>>) attributes {dimension_semantics = [#tpu.dimension_semantics<parallel>, #tpu.dimension_semantics<parallel>, #tpu.dimension_semantics<arbitrary>], iteration_bounds = array<i64: 2, 1, 1>, scalar_prefetch = 0 : i64, scratch_operands = 4 : i64, tpu.core_type = #tpu.core_type<tc>, window_params = [{transform_indices = @transform_0, window_bounds = array<i64: 1, 8, 32>}, {transform_indices = @transform_1, window_bounds = array<i64: 1, 8, 32>}, {transform_indices = @transform_2, window_bounds = array<i64: 1, 8, 32>}, {pipeline_mode = #tpu.pipeline_mode<synchronous>, transform_indices = @transform_3, window_bounds = array<i64: 32, 32>}, {pipeline_mode = #tpu.pipeline_mode<synchronous>, transform_indices = @transform_4, window_bounds = array<i64: 1, 32>}, {transform_indices = @transform_5, window_bounds = array<i64: 1, 8, 32>}]} {
    %c0_i32 = arith.constant 0 : i32
    %0 = arith.cmpi eq, %arg2, %c0_i32 : i32
    %1 = arith.extui %0 : i1 to i32
    %c0_i32_0 = arith.constant 0 : i32
    %2 = arith.cmpi ne, %1, %c0_i32_0 : i32
    scf.if %2 {
      %cst_32 = arith.constant 0xFF800000 : f32
      %53 = vector.broadcast %cst_32 : f32 to vector<4x8x1xf32>
      %c0_33 = arith.constant 0 : index
      %c0_34 = arith.constant 0 : index
      %c0_35 = arith.constant 0 : index
      %54 = vector.load %arg9[%c0_33, %c0_34, %c0_35] : memref<4x8x1xf32, #tpu.memory_space<vmem>>, vector<4x8x1xf32>
      tpu.vector_store %arg9[%c0_33, %c0_34, %c0_35], %53 {strides = array<i32>} : memref<4x8x1xf32, #tpu.memory_space<vmem>>, vector<4x8x1xf32>,
      %cst_36 = arith.constant 0.000000e+00 : f32
      %55 = vector.broadcast %cst_36 : f32 to vector<4x8x1xf32>
      %c0_37 = arith.constant 0 : index
      %c0_38 = arith.constant 0 : index
      %c0_39 = arith.constant 0 : index
      %56 = vector.load %arg10[%c0_37, %c0_38, %c0_39] : memref<4x8x1xf32, #tpu.memory_space<vmem>>, vector<4x8x1xf32>
      tpu.vector_store %arg10[%c0_37, %c0_38, %c0_39], %55 {strides = array<i32>} : memref<4x8x1xf32, #tpu.memory_space<vmem>>, vector<4x8x1xf32>,
      %cst_40 = arith.constant 0.000000e+00 : f32
      %57 = vector.broadcast %cst_40 : f32 to vector<4x8x8xf32>
      %c0_41 = arith.constant 0 : index
      %c0_42 = arith.constant 0 : index
      %c0_43 = arith.constant 0 : index
      %58 = vector.load %arg11[%c0_41, %c0_42, %c0_43] : memref<4x8x8xf32, #tpu.memory_space<vmem>>, vector<4x8x8xf32>
      tpu.vector_store %arg11[%c0_41, %c0_42, %c0_43], %57 {strides = array<i32>} : memref<4x8x8xf32, #tpu.memory_space<vmem>>, vector<4x8x8xf32>,
      %c0_44 = arith.constant 0 : index
      %c0_45 = arith.constant 0 : index
      %c0_46 = arith.constant 0 : index
      %59 = vector.load %arg3[%c0_44, %c0_45, %c0_46] : memref<1x8x32xbf16, #tpu.memory_space<vmem>>, vector<1x8x32xbf16>
      %60 = vector.shape_cast %59 : vector<1x8x32xbf16> to vector<8x32xbf16>
      %61 = vector.extract_strided_slice %60 {offsets = [0, 0], sizes = [8, 8], strides = [1, 1]} : vector<8x32xbf16> to vector<8x8xbf16>
      %62 = vector.extract_strided_slice %60 {offsets = [0, 8], sizes = [8, 8], strides = [1, 1]} : vector<8x32xbf16> to vector<8x8xbf16>
      %63 = vector.extract_strided_slice %60 {offsets = [0, 16], sizes = [8, 8], strides = [1, 1]} : vector<8x32xbf16> to vector<8x8xbf16>
      %64 = vector.extract_strided_slice %60 {offsets = [0, 24], sizes = [8, 8], strides = [1, 1]} : vector<8x32xbf16> to vector<8x8xbf16>
      %65 = vector.shape_cast %61 : vector<8x8xbf16> to vector<1x8x8xbf16>
      %66 = vector.shape_cast %62 : vector<8x8xbf16> to vector<1x8x8xbf16>
      %67 = vector.shape_cast %63 : vector<8x8xbf16> to vector<1x8x8xbf16>
      %68 = vector.shape_cast %64 : vector<8x8xbf16> to vector<1x8x8xbf16>
      %69 = tpu.concatenate %65, %66, %67, %68 in 0 : vector<1x8x8xbf16>, vector<1x8x8xbf16>, vector<1x8x8xbf16>, vector<1x8x8xbf16> -> vector<4x8x8xbf16>
      %c0_47 = arith.constant 0 : index
      %c0_48 = arith.constant 0 : index
      %c0_49 = arith.constant 0 : index
      %70 = vector.load %arg12[%c0_47, %c0_48, %c0_49] : memref<4x8x8xbf16, #tpu.memory_space<vmem>>, vector<4x8x8xbf16>
      tpu.vector_store %arg12[%c0_47, %c0_48, %c0_49], %69 {strides = array<i32>} : memref<4x8x8xbf16, #tpu.memory_space<vmem>>, vector<4x8x8xbf16>,
    } else {
    }
    %c0 = arith.constant 0 : index
    %c0_1 = arith.constant 0 : index
    %c0_2 = arith.constant 0 : index
    %3 = vector.load %arg4[%c0, %c0_1, %c0_2] : memref<1x8x32xbf16, #tpu.memory_space<vmem>>, vector<1x8x32xbf16>
    %4 = vector.shape_cast %3 : vector<1x8x32xbf16> to vector<8x32xbf16>
    %5 = vector.extract_strided_slice %4 {offsets = [0, 0], sizes = [8, 8], strides = [1, 1]} : vector<8x32xbf16> to vector<8x8xbf16>
    %6 = vector.extract_strided_slice %4 {offsets = [0, 8], sizes = [8, 8], strides = [1, 1]} : vector<8x32xbf16> to vector<8x8xbf16>
    %7 = vector.extract_strided_slice %4 {offsets = [0, 16], sizes = [8, 8], strides = [1, 1]} : vector<8x32xbf16> to vector<8x8xbf16>
    %8 = vector.extract_strided_slice %4 {offsets = [0, 24], sizes = [8, 8], strides = [1, 1]} : vector<8x32xbf16> to vector<8x8xbf16>
    %9 = vector.shape_cast %5 : vector<8x8xbf16> to vector<1x8x8xbf16>
    %10 = vector.shape_cast %6 : vector<8x8xbf16> to vector<1x8x8xbf16>
    %11 = vector.shape_cast %7 : vector<8x8xbf16> to vector<1x8x8xbf16>
    %12 = vector.shape_cast %8 : vector<8x8xbf16> to vector<1x8x8xbf16>
    %13 = tpu.concatenate %9, %10, %11, %12 in 0 : vector<1x8x8xbf16>, vector<1x8x8xbf16>, vector<1x8x8xbf16>, vector<1x8x8xbf16> -> vector<4x8x8xbf16>
    %c0_3 = arith.constant 0 : index
    %c0_4 = arith.constant 0 : index
    %c0_5 = arith.constant 0 : index
    %14 = vector.load %arg5[%c0_3, %c0_4, %c0_5] : memref<1x8x32xbf16, #tpu.memory_space<vmem>>, vector<1x8x32xbf16>
    %15 = vector.shape_cast %14 : vector<1x8x32xbf16> to vector<8x32xbf16>
    %16 = vector.extract_strided_slice %15 {offsets = [0, 0], sizes = [8, 8], strides = [1, 1]} : vector<8x32xbf16> to vector<8x8xbf16>
    %17 = vector.extract_strided_slice %15 {offsets = [0, 8], sizes = [8, 8], strides = [1, 1]} : vector<8x32xbf16> to vector<8x8xbf16>
    %18 = vector.extract_strided_slice %15 {offsets = [0, 16], sizes = [8, 8], strides = [1, 1]} : vector<8x32xbf16> to vector<8x8xbf16>
    %19 = vector.extract_strided_slice %15 {offsets = [0, 24], sizes = [8, 8], strides = [1, 1]} : vector<8x32xbf16> to vector<8x8xbf16>
    %20 = vector.shape_cast %16 : vector<8x8xbf16> to vector<1x8x8xbf16>
    %21 = vector.shape_cast %17 : vector<8x8xbf16> to vector<1x8x8xbf16>
    %22 = vector.shape_cast %18 : vector<8x8xbf16> to vector<1x8x8xbf16>
    %23 = vector.shape_cast %19 : vector<8x8xbf16> to vector<1x8x8xbf16>
    %24 = tpu.concatenate %20, %21, %22, %23 in 0 : vector<1x8x8xbf16>, vector<1x8x8xbf16>, vector<1x8x8xbf16>, vector<1x8x8xbf16> -> vector<4x8x8xbf16>
    %c0_6 = arith.constant 0 : index
    %c0_7 = arith.constant 0 : index
    %c0_8 = arith.constant 0 : index
    %25 = vector.load %arg12[%c0_6, %c0_7, %c0_8] : memref<4x8x8xbf16, #tpu.memory_space<vmem>>, vector<4x8x8xbf16>
    "tpu.trace_start"() <{level = 10 : i32, message = "hqd,hkd->hqk"}> : () -> ()
    %cst = arith.constant dense<0.000000e+00> : vector<4x8x8xf32>
    %26 = tpu.matmul %25, %13, %cst {dimension_numbers = #tpu.dot_dimension_numbers<[2], [2], [1], [1], [0, 0, 0, 1, 1, 1], [0], [0]>} : vector<4x8x8xbf16>, vector<4x8x8xbf16>, vector<4x8x8xf32> -> vector<4x8x8xf32>
    "tpu.trace_stop"() : () -> ()
    %c0_9 = arith.constant 0 : index
    %c0_10 = arith.constant 0 : index
    %c0_11 = arith.constant 0 : index
    %27 = vector.load %arg9[%c0_9, %c0_10, %c0_11] : memref<4x8x1xf32, #tpu.memory_space<vmem>>, vector<4x8x1xf32>
    %cst_12 = arith.constant dense<0xFF800000> : vector<4x8xf32>
    %28 = vector.multi_reduction <maximumf>, %26, %cst_12 [2] : vector<4x8x8xf32> to vector<4x8xf32>
    %29 = vector.shape_cast %28 : vector<4x8xf32> to vector<4x8x1xf32>
    %30 = arith.maximumf %27, %29 : vector<4x8x1xf32>
    %31 = arith.subf %27, %30 : vector<4x8x1xf32>
    %32 = math.exp %31 : vector<4x8x1xf32>
    %33 = vector.broadcast %30 : vector<4x8x1xf32> to vector<4x8x8xf32>
    %34 = arith.subf %26, %33 : vector<4x8x8xf32>
    %35 = math.exp %34 : vector<4x8x8xf32>
    %c0_13 = arith.constant 0 : index
    %c0_14 = arith.constant 0 : index
    %c0_15 = arith.constant 0 : index
    %36 = vector.load %arg10[%c0_13, %c0_14, %c0_15] : memref<4x8x1xf32, #tpu.memory_space<vmem>>, vector<4x8x1xf32>
    %37 = arith.mulf %32, %36 : vector<4x8x1xf32>
    %cst_16 = arith.constant dense<0.000000e+00> : vector<4x8xf32>
    %38 = vector.multi_reduction <add>, %35, %cst_16 [2] : vector<4x8x8xf32> to vector<4x8xf32>
    %39 = vector.shape_cast %38 : vector<4x8xf32> to vector<4x8x1xf32>
    %40 = arith.addf %37, %39 : vector<4x8x1xf32>
    %c0_17 = arith.constant 0 : index
    %c0_18 = arith.constant 0 : index
    %c0_19 = arith.constant 0 : index
    %41 = vector.load %arg10[%c0_17, %c0_18, %c0_19] : memref<4x8x1xf32, #tpu.memory_space<vmem>>, vector<4x8x1xf32>
    tpu.vector_store %arg10[%c0_17, %c0_18, %c0_19], %40 {strides = array<i32>} : memref<4x8x1xf32, #tpu.memory_space<vmem>>, vector<4x8x1xf32>,
    %c0_20 = arith.constant 0 : index
    %c0_21 = arith.constant 0 : index
    %c0_22 = arith.constant 0 : index
    %42 = vector.load %arg11[%c0_20, %c0_21, %c0_22] : memref<4x8x8xf32, #tpu.memory_space<vmem>>, vector<4x8x8xf32>
    %43 = vector.broadcast %32 : vector<4x8x1xf32> to vector<4x8x8xf32>
    %44 = arith.mulf %43, %42 : vector<4x8x8xf32>
    %45 = arith.truncf %35 : vector<4x8x8xf32> to vector<4x8x8xbf16>
    "tpu.trace_start"() <{level = 10 : i32, message = "hqk,hkd->hqd"}> : () -> ()
    %cst_23 = arith.constant dense<0.000000e+00> : vector<4x8x8xf32>
    %46 = tpu.matmul %45, %24, %cst_23 {dimension_numbers = #tpu.dot_dimension_numbers<[2], [1], [1], [2], [0, 0, 0, 1, 1, 2], [0], [0]>} : vector<4x8x8xbf16>, vector<4x8x8xbf16>, vector<4x8x8xf32> -> vector<4x8x8xf32>
    "tpu.trace_stop"() : () -> ()
    %47 = arith.addf %44, %46 : vector<4x8x8xf32>
    %c0_24 = arith.constant 0 : index
    %c0_25 = arith.constant 0 : index
    %c0_26 = arith.constant 0 : index
    %48 = vector.load %arg11[%c0_24, %c0_25, %c0_26] : memref<4x8x8xf32, #tpu.memory_space<vmem>>, vector<4x8x8xf32>
    tpu.vector_store %arg11[%c0_24, %c0_25, %c0_26], %47 {strides = array<i32>} : memref<4x8x8xf32, #tpu.memory_space<vmem>>, vector<4x8x8xf32>,
    %c0_27 = arith.constant 0 : index
    %c0_28 = arith.constant 0 : index
    %c0_29 = arith.constant 0 : index
    %49 = vector.load %arg9[%c0_27, %c0_28, %c0_29] : memref<4x8x1xf32, #tpu.memory_space<vmem>>, vector<4x8x1xf32>
    tpu.vector_store %arg9[%c0_27, %c0_28, %c0_29], %30 {strides = array<i32>} : memref<4x8x1xf32, #tpu.memory_space<vmem>>, vector<4x8x1xf32>,
    %c0_i32_30 = arith.constant 0 : i32
    %50 = arith.cmpi eq, %arg2, %c0_i32_30 : i32
    %51 = arith.extui %50 : i1 to i32
    %c0_i32_31 = arith.constant 0 : i32
    %52 = arith.cmpi ne, %51, %c0_i32_31 : i32
    scf.if %52 {
      %c0_32 = arith.constant 0 : index
      %c0_33 = arith.constant 0 : index
      %c0_34 = arith.constant 0 : index
      %53 = vector.load %arg10[%c0_32, %c0_33, %c0_34] : memref<4x8x1xf32, #tpu.memory_space<vmem>>, vector<4x8x1xf32>
      %54 = tpu.reciprocal %53 {approx = true} : vector<4x8x1xf32> -> vector<4x8x1xf32>
      %c0_35 = arith.constant 0 : index
      %c0_36 = arith.constant 0 : index
      %c0_37 = arith.constant 0 : index
      %55 = vector.load %arg11[%c0_35, %c0_36, %c0_37] : memref<4x8x8xf32, #tpu.memory_space<vmem>>, vector<4x8x8xf32>
      %56 = vector.broadcast %54 : vector<4x8x1xf32> to vector<4x8x8xf32>
      %57 = arith.mulf %55, %56 : vector<4x8x8xf32>
      %58 = vector.extract_strided_slice %57 {offsets = [0, 0, 0], sizes = [1, 8, 8], strides = [1, 1, 1]} : vector<4x8x8xf32> to vector<1x8x8xf32>
      %59 = vector.shape_cast %58 : vector<1x8x8xf32> to vector<8x8xf32>
      %60 = vector.extract_strided_slice %57 {offsets = [1, 0, 0], sizes = [1, 8, 8], strides = [1, 1, 1]} : vector<4x8x8xf32> to vector<1x8x8xf32>
      %61 = vector.shape_cast %60 : vector<1x8x8xf32> to vector<8x8xf32>
      %62 = vector.extract_strided_slice %57 {offsets = [2, 0, 0], sizes = [1, 8, 8], strides = [1, 1, 1]} : vector<4x8x8xf32> to vector<1x8x8xf32>
      %63 = vector.shape_cast %62 : vector<1x8x8xf32> to vector<8x8xf32>
      %64 = vector.extract_strided_slice %57 {offsets = [3, 0, 0], sizes = [1, 8, 8], strides = [1, 1, 1]} : vector<4x8x8xf32> to vector<1x8x8xf32>
      %65 = vector.shape_cast %64 : vector<1x8x8xf32> to vector<8x8xf32>
      %66 = tpu.concatenate %59, %61, %63, %65 in 1 : vector<8x8xf32>, vector<8x8xf32>, vector<8x8xf32>, vector<8x8xf32> -> vector<8x32xf32>
      %67 = arith.truncf %66 : vector<8x32xf32> to vector<8x32xbf16>
      %c0_38 = arith.constant 0 : index
      %c0_39 = arith.constant 0 : index
      %68 = vector.load %arg6[%c0_38, %c0_39] : memref<32x32xbf16, #tpu.memory_space<vmem>>, vector<32x32xbf16>
      %cst_40 = arith.constant dense<0.000000e+00> : vector<8x32xf32>
      %69 = tpu.matmul %67, %68, %cst_40 {dimension_numbers = #tpu.dot_dimension_numbers<[1], [0], [0], [1], [0, 0, 1, 1], [], []>} : vector<8x32xbf16>, vector<32x32xbf16>, vector<8x32xf32> -> vector<8x32xf32>
      %c0_41 = arith.constant 0 : index
      %c0_42 = arith.constant 0 : index
      %70 = vector.load %arg7[%c0_41, %c0_42] : memref<1x32xf32, #tpu.memory_space<vmem>>, vector<1x32xf32>
      %71 = vector.shape_cast %70 : vector<1x32xf32> to vector<32xf32>
      %72 = vector.shape_cast %71 : vector<32xf32> to vector<1x32xf32>
      %73 = vector.broadcast %72 : vector<1x32xf32> to vector<8x32xf32>
      %74 = arith.addf %69, %73 : vector<8x32xf32>
      %c0_43 = arith.constant 0 : index
      %c0_44 = arith.constant 0 : index
      %c0_45 = arith.constant 0 : index
      %75 = vector.load %arg8[%c0_43, %c0_44, %c0_45] : memref<1x8x32xf32, #tpu.memory_space<vmem>>, vector<1x8x32xf32>
      %76 = vector.shape_cast %75 : vector<1x8x32xf32> to vector<8x32xf32>
      %77 = vector.shape_cast %74 : vector<8x32xf32> to vector<1x8x32xf32>
      tpu.vector_store %arg8[%c0_43, %c0_44, %c0_45], %77 {strides = array<i32>} : memref<1x8x32xf32, #tpu.memory_space<vmem>>, vector<1x8x32xf32>,
    } else {
    }
    return
  }
  func.func @transform_0(%arg0: i32, %arg1: i32, %arg2: i32) -> (i32, i32, i32) {
    %c0_i32 = arith.constant 0 : i32
    %c0_i32_0 = arith.constant 0 : i32
    return %arg0, %arg1, %c0_i32 : i32, i32, i32
  }
  func.func @transform_1(%arg0: i32, %arg1: i32, %arg2: i32) -> (i32, i32, i32) {
    %c0_i32 = arith.constant 0 : i32
    %c0_i32_0 = arith.constant 0 : i32
    return %arg0, %arg2, %c0_i32 : i32, i32, i32
  }
  func.func @transform_2(%arg0: i32, %arg1: i32, %arg2: i32) -> (i32, i32, i32) {
    %c0_i32 = arith.constant 0 : i32
    %c0_i32_0 = arith.constant 0 : i32
    return %arg0, %arg2, %c0_i32 : i32, i32, i32
  }
  func.func @transform_3(%arg0: i32, %arg1: i32, %arg2: i32) -> (i32, i32) {
    %c0_i32 = arith.constant 0 : i32
    %c0_i32_0 = arith.constant 0 : i32
    %c0_i32_1 = arith.constant 0 : i32
    return %c0_i32, %c0_i32_0 : i32, i32
  }
  func.func @transform_4(%arg0: i32, %arg1: i32, %arg2: i32) -> (i32, i32) {
    %c0_i32 = arith.constant 0 : i32
    %c0_i32_0 = arith.constant 0 : i32
    %c0_i32_1 = arith.constant 0 : i32
    return %c0_i32, %c0_i32_0 : i32, i32
  }
  func.func @transform_5(%arg0: i32, %arg1: i32, %arg2: i32) -> (i32, i32, i32) {
    %c0_i32 = arith.constant 0 : i32
    %c0_i32_0 = arith.constant 0 : i32
    return %arg0, %arg1, %c0_i32 : i32, i32, i32
  }
}

module attributes {stable_mosaic.version = 11 : i64} {
  func.func @_qkv_proj_kernel(%arg0: i32, %arg1: i32, %arg2: memref<1x8x32xf32, #tpu.memory_space<vmem>>, %arg3: memref<32x96xbf16, #tpu.memory_space<vmem>>, %arg4: memref<1x96xf32, #tpu.memory_space<vmem>>, %arg5: memref<1x8x32xbf16, #tpu.memory_space<vmem>>, %arg6: memref<1x8x32xbf16, #tpu.memory_space<vmem>>, %arg7: memref<1x8x32xbf16, #tpu.memory_space<vmem>>) attributes {dimension_semantics = [#tpu.dimension_semantics<parallel>, #tpu.dimension_semantics<parallel>], iteration_bounds = array<i64: 2, 1>, scalar_prefetch = 0 : i64, scratch_operands = 0 : i64, tpu.core_type = #tpu.core_type<tc>, window_params = [{transform_indices = @transform_0, window_bounds = array<i64: 1, 8, 32>}, {pipeline_mode = #tpu.pipeline_mode<synchronous>, transform_indices = @transform_1, window_bounds = array<i64: 32, 96>}, {pipeline_mode = #tpu.pipeline_mode<synchronous>, transform_indices = @transform_2, window_bounds = array<i64: 1, 96>}, {transform_indices = @transform_3, window_bounds = array<i64: 1, 8, 32>}, {transform_indices = @transform_4, window_bounds = array<i64: 1, 8, 32>}, {transform_indices = @transform_5, window_bounds = array<i64: 1, 8, 32>}]} {
    %c0 = arith.constant 0 : index
    %c0_0 = arith.constant 0 : index
    %c0_1 = arith.constant 0 : index
    %0 = vector.load %arg2[%c0, %c0_0, %c0_1] : memref<1x8x32xf32, #tpu.memory_space<vmem>>, vector<1x8x32xf32>
    %1 = vector.shape_cast %0 : vector<1x8x32xf32> to vector<8x32xf32>
    %2 = arith.truncf %1 : vector<8x32xf32> to vector<8x32xbf16>
    %c0_2 = arith.constant 0 : index
    %c0_3 = arith.constant 0 : index
    %3 = vector.load %arg3[%c0_2, %c0_3] : memref<32x96xbf16, #tpu.memory_space<vmem>>, vector<32x96xbf16>
    %cst = arith.constant dense<0.000000e+00> : vector<8x96xf32>
    %4 = tpu.matmul %2, %3, %cst {dimension_numbers = #tpu.dot_dimension_numbers<[1], [0], [0], [1], [0, 0, 1, 1], [], []>} : vector<8x32xbf16>, vector<32x96xbf16>, vector<8x96xf32> -> vector<8x96xf32>
    %c0_4 = arith.constant 0 : index
    %c0_5 = arith.constant 0 : index
    %5 = vector.load %arg4[%c0_4, %c0_5] : memref<1x96xf32, #tpu.memory_space<vmem>>, vector<1x96xf32>
    %6 = vector.shape_cast %5 : vector<1x96xf32> to vector<96xf32>
    %7 = vector.shape_cast %6 : vector<96xf32> to vector<1x96xf32>
    %8 = vector.broadcast %7 : vector<1x96xf32> to vector<8x96xf32>
    %9 = arith.addf %4, %8 : vector<8x96xf32>
    %10 = arith.truncf %9 : vector<8x96xf32> to vector<8x96xbf16>
    %11 = vector.extract_strided_slice %10 {offsets = [0, 0], sizes = [8, 32], strides = [1, 1]} : vector<8x96xbf16> to vector<8x32xbf16>
    %c0_6 = arith.constant 0 : index
    %c0_7 = arith.constant 0 : index
    %c0_8 = arith.constant 0 : index
    %12 = vector.load %arg5[%c0_6, %c0_7, %c0_8] : memref<1x8x32xbf16, #tpu.memory_space<vmem>>, vector<1x8x32xbf16>
    %13 = vector.shape_cast %12 : vector<1x8x32xbf16> to vector<8x32xbf16>
    %14 = vector.shape_cast %11 : vector<8x32xbf16> to vector<1x8x32xbf16>
    tpu.vector_store %arg5[%c0_6, %c0_7, %c0_8], %14 {strides = array<i32>} : memref<1x8x32xbf16, #tpu.memory_space<vmem>>, vector<1x8x32xbf16>,
    %15 = vector.extract_strided_slice %10 {offsets = [0, 32], sizes = [8, 32], strides = [1, 1]} : vector<8x96xbf16> to vector<8x32xbf16>
    %c0_9 = arith.constant 0 : index
    %c0_10 = arith.constant 0 : index
    %c0_11 = arith.constant 0 : index
    %16 = vector.load %arg6[%c0_9, %c0_10, %c0_11] : memref<1x8x32xbf16, #tpu.memory_space<vmem>>, vector<1x8x32xbf16>
    %17 = vector.shape_cast %16 : vector<1x8x32xbf16> to vector<8x32xbf16>
    %18 = vector.shape_cast %15 : vector<8x32xbf16> to vector<1x8x32xbf16>
    tpu.vector_store %arg6[%c0_9, %c0_10, %c0_11], %18 {strides = array<i32>} : memref<1x8x32xbf16, #tpu.memory_space<vmem>>, vector<1x8x32xbf16>,
    %19 = vector.extract_strided_slice %10 {offsets = [0, 64], sizes = [8, 32], strides = [1, 1]} : vector<8x96xbf16> to vector<8x32xbf16>
    %c0_12 = arith.constant 0 : index
    %c0_13 = arith.constant 0 : index
    %c0_14 = arith.constant 0 : index
    %20 = vector.load %arg7[%c0_12, %c0_13, %c0_14] : memref<1x8x32xbf16, #tpu.memory_space<vmem>>, vector<1x8x32xbf16>
    %21 = vector.shape_cast %20 : vector<1x8x32xbf16> to vector<8x32xbf16>
    %22 = vector.shape_cast %19 : vector<8x32xbf16> to vector<1x8x32xbf16>
    tpu.vector_store %arg7[%c0_12, %c0_13, %c0_14], %22 {strides = array<i32>} : memref<1x8x32xbf16, #tpu.memory_space<vmem>>, vector<1x8x32xbf16>,
    return
  }
  func.func @transform_0(%arg0: i32, %arg1: i32) -> (i32, i32, i32) {
    %c0_i32 = arith.constant 0 : i32
    %c0_i32_0 = arith.constant 0 : i32
    return %arg0, %arg1, %c0_i32 : i32, i32, i32
  }
  func.func @transform_1(%arg0: i32, %arg1: i32) -> (i32, i32) {
    %c0_i32 = arith.constant 0 : i32
    %c0_i32_0 = arith.constant 0 : i32
    %c0_i32_1 = arith.constant 0 : i32
    return %c0_i32, %c0_i32_0 : i32, i32
  }
  func.func @transform_2(%arg0: i32, %arg1: i32) -> (i32, i32) {
    %c0_i32 = arith.constant 0 : i32
    %c0_i32_0 = arith.constant 0 : i32
    %c0_i32_1 = arith.constant 0 : i32
    return %c0_i32, %c0_i32_0 : i32, i32
  }
  func.func @transform_3(%arg0: i32, %arg1: i32) -> (i32, i32, i32) {
    %c0_i32 = arith.constant 0 : i32
    %c0_i32_0 = arith.constant 0 : i32
    return %arg0, %arg1, %c0_i32 : i32, i32, i32
  }
  func.func @transform_4(%arg0: i32, %arg1: i32) -> (i32, i32, i32) {
    %c0_i32 = arith.constant 0 : i32
    %c0_i32_0 = arith.constant 0 : i32
    return %arg0, %arg1, %c0_i32 : i32, i32, i32
  }
  func.func @transform_5(%arg0: i32, %arg1: i32) -> (i32, i32, i32) {
    %c0_i32 = arith.constant 0 : i32
    %c0_i32_0 = arith.constant 0 : i32
    return %arg0, %arg1, %c0_i32 : i32, i32, i32
  }
}

</mosaic_0001>

<bundles_post_ra>
// kernel: self_attention_pallas.2
= control target key start
LH: loop header
LB: loop body
LE: loop exit
PB: predicated region body
PF: predicated region fallthrough
CT: control target
= control target key end

     0   :  { %11 = vsyncpa [#allocation3], 0  ;;  %s1355_s0 = inlined_call_operand.hbm [shape: f32[2,8,32], index: 0, kind: input, shape index: {}]   ;;  %s1356_s1 = inlined_call_operand.hbm [shape: bf16[32,96], index: 1, kind: input, shape index: {}]   ;;  %s1357_s2 = inlined_call_operand.hbm [shape: f32[1,96], index: 2, kind: input, shape index: {}]   ;;  %s1358_s3 = inlined_call_operand.hbm [shape: bf16[2,8,32], index: 3, kind: output, shape index: {0}]   ;;  %s1359_s4 = inlined_call_operand.hbm [shape: bf16[2,8,32], index: 4, kind: output, shape index: {1}]   ;;  %s1360_s5 = inlined_call_operand.hbm [shape: bf16[2,8,32], index: 5, kind: output, shape index: {2}]  }
   0x1   :  { %13 = vsyncpa [#allocation3 + $0x1], 0 }
   0x2   :  { %14 = vsyncpa [#allocation6], 0 }
   0x3   :  { %15 = vsyncpa [#allocation4], 0 }
   0x4   :  { %17 = vsyncpa [#allocation4 + $0x1], 0 }
   0x5   :  { %18 = vsyncpa [#allocation10], 0 }
   0x6   :  { %20 = vsyncpa [#allocation10 + $0x1], 0  ;;  %s1022_s18 = smov 0   ;;  %s1024_s19 = smov 0  }
   0x7   :  { %s1026_s20 = smov 0   ;;  %s1028_s21 = smov 0  }
   0x8   :  { %s1030_s22 = smov 0   ;;  %s1032_s23 = smov 0  }
   0x9 LB: > { %s1053_s24 = sadd.s32 4294967295, %s978_s23   ;;  %s606_s25 = sadd.s32 4294967294, %s978_s23   ;;  %s978_s23 = sphi %s1032_s23, %s26_s23   ;;  %s974_s22 = sphi %s1030_s22, %s1381_s22   ;;  %s970_s21 = sphi %s1028_s21, %s1380_s21   ;;  %s966_s20 = sphi %s1026_s20, %s1379_s20   ;;  %s962_s19 = sphi %s1024_s19, %s1378_s19   ;;  %s958_s18 = sphi %s1022_s18, %s1377_s18  }
   0xa   : > { %p60_p0 = scmp.ne.s32.totalorder %s962_s19, %s958_s18  ;;  %p1361_p1 = scmp.eq.s32.totalorder %s1053_s24, 0 }
   0xb   : > { %p134_p3 = scmp.eq.s32.totalorder %s606_s25, 1  ;;  %p607_p5 = scmp.ge.s32.totalorder %s978_s23, 1 }
   0xc   : > { %p1064_p4 = por %p1361_p1, %p60_p0  ;;  %p197_p7 = scmp.lt.s32.totalorder %s978_s23, 3 }
   0xd   : > { %p1069_p6 = por %p134_p3, %p60_p0  ;;  %s980_s29 = smov [#allocation5]  }
   0xe   : > { %s1364_s26 = scalar_select %p1064_p4, 1, 0 }
   0xf   : > { %s1365_s27 = scalar_select %p1069_p6, 1, 0 }
  0x10   : > { %p1074_p8 = pnand %p607_p5, %p197_p7  ;;  %s209_s30 = sshll.u32 %s980_s29, 4  ;;  %s1078_s30 = int_to_ptr.vmem [resolvable:$true] %s209_s30 }
  0x11   : > { %s981_s7 = smov [#allocation7]   ;;  %s746_s11 = scalar_lea.hbm %s1356_s1, 256 }
  0x12   : > { %p661_p9 = pneg %p1074_p8  ;;  %s223_s8 = sshll.u32 %s981_s7, 4  ;;  %s1089_s8 = int_to_ptr.vmem [resolvable:$true] %s223_s8 }
  0x13   : > { %p747_p12 = scmp.ne.s32.totalorder %s1356_s1, %s746_s11  ;;  %p753_p5 = scmp.lt.u32.totalorder %s746_s11, %s1356_s1 }
  0x14   : > { %p1085_p11 = pnand %p661_p9, %p1361_p1 }
  0x16   : > { %p748_p13 = pneg %p1085_p11 }
  0x18   : > { %p749_p0 = pnand %p748_p13, %p747_p12 }
  0x1a   : > { %p750_p3 = pneg %p749_p0 }
  0x1c   : > { %p755_p7 = pnand %p753_p5, %p750_p3 }
  0x1e   : > { %758 = shalt.err (!%p755_p7)
}
  0x1f   : > { %s759_s16 = scalar_lea.vmem %s1078_s30, 256  ;;  %p767_p2 = scmp.lt.s32.totalorder %s1078_s30, %s1078_s30 }
  0x20   : > { %p760_p9 = scmp.ne.s32.totalorder %s1078_s30, %s759_s16  ;;  %p768_p12 = scmp.lt.s32.totalorder %s759_s16, %s759_s16 }
  0x22   : > { %p762_p10 = pnand %p760_p9, %p748_p13  ;;  %p769_p0 = por %p768_p12, %p767_p2 }
  0x24   : > { %p763_p1 = pneg %p762_p10 }
  0x26   : > { %p770_p6 = pnand %p769_p0, %p763_p1 }
  0x28   : > { %773 = shalt.err (!%p770_p6)
}
  0x29   : > { %s982_s17 = smov 64   ;;  %s983_s29 = smov 4  }
  0x2a   : > { %664 = dma.hbm_to_vmem [thread:$0]  (!%p1085_p11), %s1356_s1, 256, %s1078_s30, [#allocation6], %s982_s17, %s982_s17, %s983_s29  }
  0x2b   : > { %s774_s12 = scalar_lea.hbm %s1357_s2, 16 }
  0x2c   : > { %p775_p2 = scmp.ne.s32.totalorder %s1357_s2, %s774_s12  ;;  %p781_p10 = scmp.lt.u32.totalorder %s774_s12, %s1357_s2 }
  0x2e   : > { %p777_p1 = pnand %p775_p2, %p748_p13 }
  0x30   : > { %p778_p6 = pneg %p777_p1 }
  0x32   : > { %p783_p3 = pnand %p781_p10, %p778_p6 }
  0x34   : > { %786 = shalt.err (!%p783_p3)
}
  0x35   : > { %s787_s30 = scalar_lea.vmem %s1089_s8, 16  ;;  %s794_s17 = scalar_lea.vmem %s1089_s8, 32 }
  0x36   : > { %p788_p5 = scmp.ne.s32.totalorder %s1089_s8, %s787_s30  ;;  %p795_p12 = scmp.lt.s32.totalorder %s1089_s8, %s1089_s8 }
  0x37   : > { %p796_p0 = scmp.lt.s32.totalorder %s794_s17, %s787_s30 }
  0x38   : > { %p790_p7 = pnand %p788_p5, %p748_p13 }
  0x39   : > { %p797_p2 = por %p796_p0, %p795_p12 }
  0x3a   : > { %p791_p9 = pneg %p790_p7 }
  0x3c   : > { %p798_p1 = pnand %p797_p2, %p791_p9 }
  0x3e   : > { %801 = shalt.err (!%p798_p1)
}
  0x3f   : > { %667 = dma.hbm_to_vmem [thread:$0]  (!%p1085_p11), %s1357_s2, 16, %s1089_s8, [#allocation6]  }
  0x40   : > { %s38_s9 = sadd.s32 1, %s974_s22  ;;  %s47_s10 = sadd.s32 1, %s966_s20 }
  0x41   : > { %p40_p13 = scmp.ge.s32.totalorder %s38_s9, 2  ;;  %p54_p6 = scmp.ne.s32.totalorder %s966_s20, %s962_s19 }
  0x42   : > { %p55_p10 = scmp.eq.s32.totalorder %s978_s23, 0  ;;  %p684_p3 = scmp.lt.s32.totalorder %s978_s23, 2 }
  0x43   : > { %s1383_s9 = smov (%p40_p13, %s38_s9), 0  ;;  %p1368_p7 = scmp.eq.s32.totalorder %s1053_s24, 1 }
  0x44   : > { %p56_p5 = por %p55_p10, %p54_p6  ;;  %s42_s11 = ssub.s32 %s974_s22, %s1383_s9 }
  0x45   : > { %p1154_p9 = por %p1368_p7, %p54_p6  ;;  %s234_s12 = sand.u32 1, %s966_s20  }
  0x46   : > { %p45_p12 = scmp.eq.s32.totalorder %s42_s11, 0  ;;  %s611_s8 = sshll.u32 %s234_s12, 3 }
  0x47   : > { %s1369_s6 = scalar_select %p1154_p9, 1, 0 }
  0x48   : > { %s612_s13 = sshll.u32 %s974_s22, 7  ;;  %s238_s17 = scalar_lea.vmem [#allocation2], %s611_s8 }
  0x49   : > { %s1163_s14 = scalar_select %p45_p12, %s966_s20, %s47_s10  }
  0x4a   : > { %s1168_s30 = scalar_lea.hbm %s1355_s0, %s612_s13  ;;  %s246_s29 = sshll.u32 %s238_s17, 4  ;;  %s1176_s29 = int_to_ptr.vmem [resolvable:$true] %s246_s29 }
  0x4b   : > { %p1172_p11 = pnand %p684_p3, %p56_p5  ;;  %s235_s10 = scalar_lea.sflag [#allocation3], %s234_s12 }
  0x4c   : > { %s802_s11 = scalar_lea.hbm %s1168_s30, 128  ;;  %s807_s15 = scalar_lea.hbm %s1355_s0, 256 }
  0x4d   : > { %p803_p0 = scmp.ne.s32.totalorder %s1168_s30, %s802_s11  ;;  %p804_p2 = pneg %p1172_p11 }
  0x4e   : > { %p808_p6 = scmp.lt.u32.totalorder %s1168_s30, %s1355_s0  ;;  %p809_p10 = scmp.lt.u32.totalorder %s807_s15, %s802_s11 }
  0x4f   : > { %p805_p1 = pnand %p804_p2, %p803_p0  ;;  %p811_p5 = scmp.lt.u32.totalorder %s802_s11, %s1168_s30 }
  0x50   : > { %p810_p3 = por %p809_p10, %p808_p6 }
  0x51   : > { %p806_p13 = pneg %p805_p1 }
  0x52   : > { %p812_p7 = por %p811_p5, %p810_p3 }
  0x54   : > { %p813_p12 = pnand %p812_p7, %p806_p13 }
  0x56   : > { %816 = shalt.err (!%p813_p12)
}
  0x57   : > { %s817_s12 = scalar_lea.vmem %s1176_s29, 128  ;;  %s984_s8 = smov [#allocation2]  }
  0x58   : > { %p818_p0 = scmp.ne.s32.totalorder %s1176_s29, %s817_s12  ;;  %s822_s13 = sshll.u32 %s984_s8, 4  ;;  %s823_s13 = int_to_ptr.vmem [resolvable:$false] %s822_s13 }
  0x59   : > { %s824_s16 = scalar_lea.vmem %s823_s13, 256  ;;  %p825_p4 = scmp.lt.s32.totalorder %s1176_s29, %s823_s13 }
  0x5a   : > { %p820_p1 = pnand %p818_p0, %p804_p2  ;;  %p826_p6 = scmp.lt.s32.totalorder %s824_s16, %s817_s12 }
  0x5c   : > { %p821_p9 = pneg %p820_p1  ;;  %p827_p10 = por %p826_p6, %p825_p4 }
  0x5e   : > { %p828_p3 = pnand %p827_p10, %p821_p9 }
  0x60   : > { %831 = shalt.err (!%p828_p3)
}
  0x61   : > { %671 = dma.hbm_to_vmem [thread:$0]  (!%p1172_p11), %s1168_s30, 128, %s1176_s29, %s235_s10  }
  0x62   : > { %255 = sbr.rel (%p1074_p8) target bundleno = 486 (0x1e6), region = 32  ;;  %s1206_s11 = sand.u32 (!%p1074_p8), 1, %s962_s19  }
  0x63   : > { %s614_s15 = sshll.u32 (!%p1074_p8), %s1206_s11, 3  ;;  %s258_s17 = scalar_lea.sflag (!%p1074_p8), [#allocation3], %s1206_s11 }
  0x64   : > { %s261_s12 = scalar_lea.vmem (!%p1074_p8), [#allocation2], %s614_s15  ;;  %p1371_p4 = scmp.ne.s32.totalorder (!%p1074_p8), %s1364_s26, 0 }
  0x69   : > { %941 = dma.done.wait (%p1371_p4), %s258_s17, 128  }
  0x6a   : > { %943 = vsyncadd (%p1371_p4), %s258_s17, 4294967168  ;;  %p1372_p9 = scmp.eq.s32.totalorder %s1053_s24, 0 }
  0x6c   : > { %945 = dma.done.wait (%p1372_p9), [#allocation6], 272   ;;  %p1373_p11 = pmov %p1372_p9 }
  0x6d   : > { %v985_v0 = vmov 0.0   ;;  %vm986_vm0 = vmmov 0   ;;  %v744_v1 = vld [vmem:[#allocation5] sm:$0xff]   ;;  %v745_v2 = vld [vmem:[#allocation5 + $0x8] sm:$0xff]   ;;  %v307_v3 = vld [vmem:[%s261_s12] sm:$0xff]  ;;  %vm332_vm1 = vcmask 261120  }
  0x6e   : > { %947 = vsyncadd (%p1373_p11), [#allocation6], 4294967024  ;;  %637 = vmatprep.subr.bf16.mxu0 %v985_v0  ;;  %641 = vmatprep.mubr.msk.bf16.mxu0 %vm986_vm0, %v985_v0  ;;  %v308_v4 = vpack.c.bf16 %v307_v3, %v307_v3  ;;  %s1219_s26 = sshll.u32 %s1206_s11, 2  ;;  %v620_v5 = vld [vmem:[#allocation7] ss:$0 sm:$0xff]  ;;  %s1222_s28 = sshll.u32 %s970_s21, 6 }
  0x6f   : > { %638 = vmatpush3.bf16.msra.mxu0 %v744_v1  ;;  %s291_s30 = scalar_lea.vmem [#allocation8], %s1219_s26  ;;  %vm377_vm2 = vcmask 257024   ;;  %s1229_s8 = scalar_lea.hbm %s1358_s3, %s1222_s28 }
  0x70   : > { %639 = vmatprep.subr.bf16.mxu0 %v985_v0  ;;  %s415_s29 = sshll.u32 %s291_s30, 4  ;;  %s987_s21 = smov 96   ;;  %s1231_s29 = int_to_ptr.vmem [resolvable:$true] %s415_s29 }
  0x71   : > { %s391_s13 = scalar_lea.sflag [#allocation4], %s1206_s11  ;;  %s832_s16 = scalar_lea.vmem %s1231_s29, 64 }
  0x72   : > { %p833_p8 = scmp.ne.s32.totalorder %s1231_s29, %s832_s16  ;;  %p1374_p2 = scmp.ne.s32.totalorder %s1369_s6, 0 }
  0x73   : > { %640 = vmatpush3.bf16.msra.mxu0 %v745_v2  ;;  %s988_s15 = smov [#allocation8]  }
  0x74   : > { %p834_p13 = pnand %p833_p8, %p1374_p2  ;;  %s836_s17 = sshll.u32 %s988_s15, 4  ;;  %s837_s17 = int_to_ptr.vmem [resolvable:$false] %s836_s17 }
  0x75   : > { %s838_s12 = scalar_lea.vmem %s837_s17, 128  ;;  %p839_p7 = scmp.lt.s32.totalorder %s1231_s29, %s837_s17 }
  0x76   : > { %642 = vmatmul.mubr.msk.bf16.vlgmr.msra.gmra.mrb[0].mxu0 %vm332_vm1, %v308_v4  ;;  %p835_p5 = pneg %p834_p13  ;;  %p840_p12 = scmp.lt.s32.totalorder %s838_s12, %s832_s16 }
  0x78   : > { %p841_p0 = por %p840_p12, %p839_p7 }
  0x7a   : > { %p842_p1 = pnand %p841_p0, %p835_p5 }
 0x149   : > { %v370_v6 = vpop.f32.mrb[0].mxu0 }
 0x14a   : > { %v371_v7 = vadd.f32 %v620_v5, %v370_v6  ;;  %v643_v8 = vpop.f32.mrb[1].mxu0 }
 0x14b   : > { %v373_v9 = vpop.f32.mrb[2].mxu0 }
 0x14c   : > { %v376_v10 = vpack.c.bf16 %v371_v7, %v371_v7  ;;  %v644_v11 = vpop.f32.mrb[3].mxu0 }
 0x14e   : > { %382 = vrot.lane.b32.xlu0 %v376_v10, %s987_s21  ;;  %378 = vst.msk [vmem:[%s291_s30] sm:$0xf] %vm377_vm2, %v376_v10 }
 0x14f   : > { %845 = shalt.err (!%p842_p1)
}
 0x150   : > { %s846_s11 = scalar_lea.hbm %s1229_s8, 64  ;;  %s850_s10 = scalar_lea.hbm %s1358_s3, 128 }
 0x151   : > { %p847_p6 = scmp.ne.s32.totalorder %s1229_s8, %s846_s11  ;;  %p851_p4 = scmp.lt.u32.totalorder %s1229_s8, %s1358_s3 }
 0x152   : > { %p852_p9 = scmp.lt.u32.totalorder %s850_s10, %s846_s11  ;;  %p854_p8 = scmp.lt.u32.totalorder %s846_s11, %s1229_s8 }
 0x153   : > { %p848_p10 = pnand %p847_p6, %p1374_p2 }
 0x154   : > { %p853_p11 = por %p852_p9, %p851_p4 }
 0x155   : > { %p849_p3 = pneg %p848_p10 }
 0x156   : > { %p855_p13 = por %p854_p8, %p853_p11 }
 0x158   : > { %p856_p5 = pnand %p855_p13, %p849_p3 }
 0x15a   : > { %859 = shalt.err (!%p856_p5)
}
 0x15b   : > { %655 = dma.vmem_to_hbm [thread:$0]  (%p1374_p2), %s1231_s29, 64, %s1229_s8, %s391_s13  }
 0x15c   : > { %s989_s16 = smov 64   ;;  %s395_s17 = sand.u32 1, %s1053_s24  }
 0x15d   : > { %386 = vrot.lane.b32.xlu0 %v376_v10, %s989_s16  ;;  %s298_s12 = scalar_lea.vmem [#allocation9], %s1219_s26  ;;  %s1262_s10 = scalar_lea.hbm %s1359_s4, %s1222_s28 }
 0x15e   : > { %s429_s30 = sshll.u32 %s298_s12, 4  ;;  %s305_s21 = scalar_lea.vmem [#allocation11], %s1219_s26  ;;  %s1264_s30 = int_to_ptr.vmem [resolvable:$true] %s429_s30 }
 0x15f   : > { %s1269_s15 = sshll.u32 %s305_s21, 4  ;;  %s1272_s24 = scalar_lea.sflag [#allocation10], %s395_s17  ;;  %s1303_s15 = int_to_ptr.vmem [resolvable:$true] %s1269_s15 }
 0x160   : > { %s860_s29 = scalar_lea.vmem %s1264_s30, 64  ;;  %s990_s8 = smov [#allocation9]  }
 0x161   : > { %p861_p7 = scmp.ne.s32.totalorder %s1264_s30, %s860_s29  ;;  %s864_s13 = sshll.u32 %s990_s8, 4  ;;  %s865_s13 = int_to_ptr.vmem [resolvable:$false] %s864_s13 }
 0x162   : > { %s866_s16 = scalar_lea.vmem %s865_s13, 128  ;;  %p867_p1 = scmp.lt.s32.totalorder %s1264_s30, %s865_s13 }
 0x163   : > { %p862_p12 = pnand %p861_p7, %p1374_p2  ;;  %p868_p6 = scmp.lt.s32.totalorder %s866_s16, %s860_s29 }
 0x165   : > { %p863_p0 = pneg %p862_p12  ;;  %p869_p10 = por %p868_p6, %p867_p1 }
 0x167   : > { %p870_p3 = pnand %p869_p10, %p863_p0 }
 0x1c0   : > { %v383_v12 = vpop.permute.xlu0 %382 }
 0x1c1   : > { %385 = vst.msk [vmem:[%s298_s12] sm:$0xf] %vm377_vm2, %v383_v12 }
 0x1c2   : > { %873 = shalt.err (!%p870_p3)
}
 0x1c3   : > { %s874_s17 = scalar_lea.hbm %s1262_s10, 64  ;;  %s878_s7 = scalar_lea.hbm %s1359_s4, 128 }
 0x1c4   : > { %p875_p4 = scmp.ne.s32.totalorder %s1262_s10, %s874_s17  ;;  %p879_p8 = scmp.lt.u32.totalorder %s1262_s10, %s1359_s4 }
 0x1c5   : > { %p880_p13 = scmp.lt.u32.totalorder %s878_s7, %s874_s17  ;;  %p882_p7 = scmp.lt.u32.totalorder %s874_s17, %s1262_s10 }
 0x1c6   : > { %p876_p9 = pnand %p875_p4, %p1374_p2 }
 0x1c7   : > { %p881_p5 = por %p880_p13, %p879_p8 }
 0x1c8   : > { %p877_p11 = pneg %p876_p9 }
 0x1c9   : > { %p883_p12 = por %p882_p7, %p881_p5 }
 0x1cb   : > { %p884_p0 = pnand %p883_p12, %p877_p11 }
 0x1cd   : > { %887 = shalt.err (!%p884_p0)
}
 0x1ce   : > { %656 = dma.vmem_to_hbm [thread:$0]  (%p1374_p2), %s1264_s30, 64, %s1262_s10, %s1272_s24  }
 0x1cf   : > { %s1300_s12 = scalar_lea.hbm %s1360_s5, %s1222_s28  ;;  %v387_v13 = vpop.permute.xlu0 %386  ;;  %s888_s17 = scalar_lea.vmem %s1303_s15, 64 }
 0x1d0   : > { %389 = vst.msk [vmem:[%s305_s21] sm:$0xf] %vm377_vm2, %v387_v13  ;;  %p889_p1 = scmp.ne.s32.totalorder %s1303_s15, %s888_s17  ;;  %s991_s30 = smov [#allocation11]  }
 0x1d1   : > { %s892_s10 = sshll.u32 %s991_s30, 4  ;;  %s893_s10 = int_to_ptr.vmem [resolvable:$false] %s892_s10 }
 0x1d2   : > { %p890_p6 = pnand %p889_p1, %p1374_p2  ;;  %s894_s11 = scalar_lea.vmem %s893_s10, 128 }
 0x1d3   : > { %p895_p3 = scmp.lt.s32.totalorder %s1303_s15, %s893_s10  ;;  %p896_p4 = scmp.lt.s32.totalorder %s894_s11, %s888_s17 }
 0x1d4   : > { %p891_p10 = pneg %p890_p6 }
 0x1d5   : > { %p897_p9 = por %p896_p4, %p895_p3 }
 0x1d7   : > { %p898_p11 = pnand %p897_p9, %p891_p10 }
 0x1d9   : > { %901 = shalt.err (!%p898_p11)
}
 0x1da   : > { %s902_s26 = scalar_lea.hbm %s1300_s12, 64  ;;  %s906_s7 = scalar_lea.hbm %s1360_s5, 128 }
 0x1db   : > { %p903_p8 = scmp.ne.s32.totalorder %s1300_s12, %s902_s26  ;;  %p907_p7 = scmp.lt.u32.totalorder %s1300_s12, %s1360_s5 }
 0x1dc   : > { %p908_p12 = scmp.lt.u32.totalorder %s906_s7, %s902_s26  ;;  %p910_p1 = scmp.lt.u32.totalorder %s902_s26, %s1300_s12 }
 0x1dd   : > { %p904_p13 = pnand %p903_p8, %p1374_p2 }
 0x1de   : > { %p909_p0 = por %p908_p12, %p907_p7 }
 0x1df   : > { %p905_p5 = pneg %p904_p13 }
 0x1e0   : > { %p911_p6 = por %p910_p1, %p909_p0 }
 0x1e2   : > { %p912_p10 = pnand %p911_p6, %p905_p5 }
 0x1e4   : > { %915 = shalt.err (!%p912_p10)
}
 0x1e5   : > { %657 = dma.vmem_to_hbm [thread:$0]  (%p1374_p2), %s1303_s15, 64, %s1300_s12, %s1272_s24  }
 0x1e6 PF: > { %s455_s29 = sand.u32 1, %s958_s18   ;;  %p1375_p3 = scmp.ne.s32.totalorder %s1365_s27, 0 }
 0x1e7   : > { %p1376_p4 = scmp.ge.s32.totalorder %s978_s23, 2  ;;  %s456_s16 = scalar_lea.sflag [#allocation4], %s455_s29 }
 0x1e9   : > { %p673_p9 = pnand %p1376_p4, %p1375_p3 }
 0x1eb   : > { %949 = dma.done.wait (!%p673_p9), %s456_s16, 64  }
 0x1ec   : > { %951 = vsyncadd (!%p673_p9), %s456_s16, 4294967232  ;;  %s464_s17 = sand.u32 1, %s606_s25  }
 0x1ed   : > { %s465_s30 = scalar_lea.sflag [#allocation10], %s464_s17 }
 0x1ee   : > { %953 = dma.done.wait (!%p673_p9), %s465_s30, 128  }
 0x1ef   : > { %955 = vsyncadd (!%p673_p9), %s465_s30, 4294967168  ;;  %s26_s23 = sadd.s32 1, %s978_s23   ;;  %s1377_s18 = smov %s962_s19 }
 0x1f0   : > { %p23_p2 = scmp.ge.s32.totalorder %s26_s23, 4   ;;  %s1378_s19 = smov %s966_s20 }
 0x1f1   : > { %s1379_s20 = smov %s1163_s14  ;;  %s1380_s21 = smov %s974_s22 }
 0x1f2   : > { %s1381_s22 = smov %s1383_s9  ;;  %25 = sbr.rel (!%p23_p2) target bundleno = 9 (0x9), region = 117 }
 0x1f9   :  { %479 = vsyncpa [#allocation3], 1 }
 0x1fa   :  { %481 = vsyncpa [#allocation3 + $0x1], 1 }
 0x1fb   :  { %482 = vsyncpa [#allocation6], 1 }
 0x1fc   :  { %483 = vsyncpa [#allocation4], 1 }
 0x1fd   :  { %485 = vsyncpa [#allocation4 + $0x1], 1 }
 0x1fe   :  { %486 = vsyncpa [#allocation10], 1 }
 0x1ff   :  { %488 = vsyncpa [#allocation10 + $0x1], 1 }

// kernel: self_attention_pallas.3
= control target key start
LH: loop header
LB: loop body
LE: loop exit
PB: predicated region body
PF: predicated region fallthrough
CT: control target
= control target key end

     0   :  { %s2205_s0 = inlined_call_operand.hbm [shape: bf16[2,8,32], index: 0, kind: input, shape index: {}]   ;;  %s2206_s1 = inlined_call_operand.hbm [shape: bf16[2,8,32], index: 1, kind: input, shape index: {}]   ;;  %s2207_s2 = inlined_call_operand.hbm [shape: bf16[2,8,32], index: 2, kind: input, shape index: {}]   ;;  %s2208_s3 = inlined_call_operand.hbm [shape: bf16[32,32], index: 3, kind: input, shape index: {}]   ;;  %s2209_s4 = inlined_call_operand.hbm [shape: f32[1,32], index: 4, kind: input, shape index: {}]   ;;  %s2210_s5 = inlined_call_operand.hbm [shape: f32[2,8,32], index: 5, kind: output, shape index: {}]  }
   0x1   :  { %2225 = sst [smem:[#allocation23_spill]] %s2206_s1 }
   0x2   :  { %2226 = sst [smem:[#allocation24_spill]] %s2208_s3 }
   0x3   :  { %2227 = sst [smem:[#allocation25_spill]] %s2209_s4 }
   0x4   :  { %10 = vsyncpa [#allocation7], 0 }
   0x5   :  { %12 = vsyncpa [#allocation7 + $0x1], 0 }
   0x6   :  { %13 = vsyncpa [#allocation10], 0 }
   0x7   :  { %15 = vsyncpa [#allocation10 + $0x1], 0 }
   0x8   :  { %16 = vsyncpa [#allocation13], 0 }
   0x9   :  { %17 = vsyncpa [#allocation8], 0 }
   0xa   :  { %19 = vsyncpa [#allocation8 + $0x1], 0  ;;  %s1746_s18 = smov 0   ;;  %s1748_s19 = smov 0  }
   0xb   :  { %s1750_s20 = smov 0   ;;  %s1752_s21 = smov 0  }
   0xc   :  { %s1754_s22 = smov 0   ;;  %s1756_s23 = smov 0  }
   0xd LB: > { %2228 = sst [smem:[#allocation20_spill]] %s1692_s22  ;;  %s1777_s24 = sadd.s32 4294967295, %s1696_s23   ;;  %s1696_s23 = sphi %s1756_s23, %s25_s23   ;;  %s1692_s22 = sphi %s1754_s22, %s2258_s22   ;;  %s1688_s21 = sphi %s1752_s21, %s2257_s21   ;;  %s1684_s20 = sphi %s1750_s20, %s2261_s20   ;;  %s1680_s19 = sphi %s1748_s19, %s2260_s19   ;;  %s1676_s18 = sphi %s1746_s18, %s2259_s18  }
   0xe   : > { %s1218_s25 = sadd.s32 4294967294, %s1696_s23   ;;  %p66_p0 = scmp.ne.s32.totalorder %s1680_s19, %s1676_s18 }
   0xf   : > { %p2211_p1 = scmp.eq.s32.totalorder %s1777_s24, 0  ;;  %p196_p3 = scmp.eq.s32.totalorder %s1218_s25, 1 }
  0x10   : > { %p1219_p5 = scmp.ge.s32.totalorder %s1696_s23, 1  ;;  %p203_p7 = scmp.lt.s32.totalorder %s1696_s23, 3 }
  0x11   : > { %p1786_p4 = por %p2211_p1, %p66_p0  ;;  %p1791_p6 = por %p196_p3, %p66_p0 }
  0x12   : > { %p1796_p8 = pnand %p1219_p5, %p203_p7  ;;  %s1698_s29 = smov [#allocation12]  }
  0x13   : > { %s2229_s26 = scalar_select %p1786_p4, 1, 0 }
  0x14   : > { %s2230_s27 = scalar_select %p1791_p6, 1, 0 }
  0x15   : > { %s2231_s28 = scalar_select %p1796_p8, 1, 0 }
  0x16   : > { %s215_s30 = sshll.u32 %s1698_s29, 4  ;;  %p1343_p9 = pneg %p1796_p8  ;;  %s216_s30 = int_to_ptr.vmem [resolvable:$true] %s215_s30 }
  0x17   : > { %s44_s7 = sadd.s32 1, %s1692_s22  ;;  %s2233_s3 = sld [smem:[#allocation24_spill]] }
  0x18   : > { %p1805_p11 = pnand %p1343_p9, %p2211_p1 }
  0x1a   : > { %s2232_s6 = scalar_select %p1805_p11, 1, 0 }
  0x1b   : > { %p2217_p13 = pneg %p1805_p11 }
  0x1d   : > { %s1460_s10 = scalar_lea.hbm %s2233_s3, 256 }
  0x1e   : > { %p1461_p12 = scmp.ne.s32.totalorder %s2233_s3, %s1460_s10  ;;  %p1467_p5 = scmp.lt.u32.totalorder %s1460_s10, %s2233_s3 }
  0x20   : > { %p1463_p0 = pnand %p2217_p13, %p1461_p12 }
  0x22   : > { %p1464_p3 = pneg %p1463_p0 }
  0x24   : > { %p1469_p7 = pnand %p1467_p5, %p1464_p3 }
  0x26   : > { %1472 = shalt.err (!%p1469_p7)
}
  0x27   : > { %s1473_s15 = scalar_lea.vmem %s216_s30, 256  ;;  %p1481_p2 = scmp.lt.s32.totalorder %s216_s30, %s216_s30 }
  0x28   : > { %p1474_p9 = scmp.ne.s32.totalorder %s216_s30, %s1473_s15  ;;  %p1482_p6 = scmp.lt.s32.totalorder %s1473_s15, %s1473_s15 }
  0x2a   : > { %p1476_p10 = pnand %p1474_p9, %p2217_p13  ;;  %p1483_p4 = por %p1482_p6, %p1481_p2 }
  0x2c   : > { %p1477_p1 = pneg %p1476_p10 }
  0x2e   : > { %p1484_p8 = pnand %p1483_p4, %p1477_p1 }
  0x30   : > { %1487 = shalt.err (!%p1484_p8)
}
  0x31   : > { %s1699_s16 = smov 64   ;;  %s1700_s17 = smov 4  }
  0x32   : > { %1346 = dma.hbm_to_vmem [thread:$0]  (!%p1805_p11), %s2233_s3, 256, %s216_s30, [#allocation13], %s1699_s16, %s1699_s16, %s1700_s17  }
  0x33   : > { %p46_p1 = scmp.ge.s32.totalorder %s44_s7, 2  ;;  %s53_s8 = sadd.s32 1, %s1684_s20 }
  0x34   : > { %p60_p2 = scmp.ne.s32.totalorder %s1684_s20, %s1680_s19  ;;  %p61_p4 = scmp.eq.s32.totalorder %s1696_s23, 0 }
  0x35   : > { %s2263_s7 = smov (%p46_p1, %s44_s7), 0  ;;  %p2235_p8 = scmp.eq.s32.totalorder %s1777_s24, 1 }
  0x36   : > { %2234 = sst [smem:[#allocation21_spill]] %s2263_s7  ;;  %p62_p6 = por %p61_p4, %p60_p2 }
  0x37   : > { %p1840_p10 = por %p2235_p8, %p60_p2  ;;  %s48_s10 = ssub.s32 %s1692_s22, %s2263_s7 }
  0x38   : > { %p1366_p12 = scmp.lt.s32.totalorder %s1696_s23, 2  ;;  %p51_p0 = scmp.eq.s32.totalorder %s48_s10, 0 }
  0x39   : > { %s2236_s9 = scalar_select %p1840_p10, 1, 0 }
  0x3a   : > { %s2214_s11 = sand.u32 1, %s1684_s20   ;;  %s1853_s12 = sshll.u32 %s1692_s22, 6 }
  0x3b   : > { %s1850_s30 = sshll.u32 %s2214_s11, 2  ;;  %p1858_p3 = pnand %p1366_p12, %p62_p6 }
  0x3c   : > { %s1856_s13 = scalar_select %p51_p0, %s1684_s20, %s53_s8  }
  0x3d   : > { %s2238_s14 = scalar_select %p1858_p3, 1, 0 }
  0x3e   : > { %2237 = sst [smem:[#allocation22_spill]] %s1856_s13  ;;  %s259_s15 = sand.u32 1, %s1696_s23  }
  0x3f   : > { %s2239_s1 = sld [smem:[#allocation23_spill]]  ;;  %s263_s29 = scalar_lea.vmem [#allocation9], %s1850_s30 }
  0x40   : > { %s271_s10 = sshll.u32 %s263_s29, 4  ;;  %s1701_s8 = smov [#allocation14]   ;;  %s1870_s10 = int_to_ptr.vmem [resolvable:$true] %s271_s10 }
  0x41   : > { %s1872_s11 = sshll.u32 %s1701_s8, 4  ;;  %s1874_s3 = scalar_lea.sflag [#allocation10], %s259_s15  ;;  %s230_s11 = int_to_ptr.vmem [resolvable:$true] %s1872_s11 }
  0x42   : > { %p1880_p7 = pneg %p1858_p3 }
  0x44   : > { %s2240_s16 = scalar_select %p1880_p7, 1, 0 }
  0x45   : > { %s1867_s25 = scalar_lea.hbm %s2239_s1, %s1853_s12  ;;  %s1493_s22 = scalar_lea.hbm %s2239_s1, 128 }
  0x46   : > { %s1488_s7 = scalar_lea.hbm %s1867_s25, 64  ;;  %p1494_p2 = scmp.lt.u32.totalorder %s1867_s25, %s2239_s1 }
  0x47   : > { %p1489_p5 = scmp.ne.s32.totalorder %s1867_s25, %s1488_s7  ;;  %p1495_p4 = scmp.lt.u32.totalorder %s1493_s22, %s1488_s7 }
  0x48   : > { %p1497_p8 = scmp.lt.u32.totalorder %s1488_s7, %s1867_s25 }
  0x49   : > { %p1491_p9 = pnand %p1880_p7, %p1489_p5  ;;  %p1496_p6 = por %p1495_p4, %p1494_p2 }
  0x4b   : > { %p1492_p1 = pneg %p1491_p9  ;;  %p1498_p12 = por %p1497_p8, %p1496_p6 }
  0x4d   : > { %p1499_p0 = pnand %p1498_p12, %p1492_p1 }
  0x4f   : > { %1502 = shalt.err (!%p1499_p0)
}
  0x50   : > { %s1503_s15 = scalar_lea.vmem %s1870_s10, 64  ;;  %s1702_s17 = smov [#allocation9]  }
  0x51   : > { %p1504_p5 = scmp.ne.s32.totalorder %s1870_s10, %s1503_s15  ;;  %s1508_s29 = sshll.u32 %s1702_s17, 4  ;;  %s1509_s29 = int_to_ptr.vmem [resolvable:$false] %s1508_s29 }
  0x52   : > { %s1510_s13 = scalar_lea.vmem %s1509_s29, 128  ;;  %p1511_p10 = scmp.lt.s32.totalorder %s1870_s10, %s1509_s29 }
  0x53   : > { %p1506_p9 = pnand %p1504_p5, %p1880_p7  ;;  %p1512_p11 = scmp.lt.s32.totalorder %s1510_s13, %s1503_s15 }
  0x55   : > { %p1507_p13 = pneg %p1506_p9  ;;  %p1513_p2 = por %p1512_p11, %p1511_p10 }
  0x57   : > { %p1514_p4 = pnand %p1513_p2, %p1507_p13 }
  0x59   : > { %1517 = shalt.err (!%p1514_p4)
}
  0x5a   : > { %1356 = dma.hbm_to_vmem [thread:$0]  (!%p1858_p3), %s1867_s25, 64, %s1870_s10, %s1874_s3  }
  0x5b   : > { %s2241_s4 = sld [smem:[#allocation25_spill]]  ;;  %p2242_p11 = scmp.ne.s32.totalorder %s2232_s6, 0 }
  0x5d   : > { %p2243_p13 = pneg %p2242_p11 }
  0x61   : > { %s1518_s8 = scalar_lea.hbm %s2241_s4, 16 }
  0x62   : > { %p1519_p1 = scmp.ne.s32.totalorder %s2241_s4, %s1518_s8  ;;  %p1525_p8 = scmp.lt.u32.totalorder %s1518_s8, %s2241_s4 }
  0x64   : > { %p1521_p10 = pnand %p1519_p1, %p2243_p13 }
  0x66   : > { %p1522_p6 = pneg %p1521_p10 }
  0x68   : > { %p1527_p12 = pnand %p1525_p8, %p1522_p6 }
  0x6a   : > { %1530 = shalt.err (!%p1527_p12)
}
  0x6b   : > { %s1531_s25 = scalar_lea.vmem %s230_s11, 16  ;;  %p2244_p5 = pmov %p2243_p13 }
  0x6c   : > { %p1532_p0 = scmp.ne.s32.totalorder %s230_s11, %s1531_s25  ;;  %s1538_s10 = scalar_lea.vmem %s230_s11, 32 }
  0x6d   : > { %p1539_p4 = scmp.lt.s32.totalorder %s230_s11, %s230_s11  ;;  %p1540_p3 = scmp.lt.s32.totalorder %s1538_s10, %s1531_s25 }
  0x6e   : > { %p1534_p9 = pnand %p1532_p0, %p2244_p5 }
  0x6f   : > { %p1541_p7 = por %p1540_p3, %p1539_p4 }
  0x70   : > { %p1535_p2 = pneg %p1534_p9 }
  0x72   : > { %p1542_p1 = pnand %p1541_p7, %p1535_p2 }
  0x74   : > { %1545 = shalt.err (!%p1542_p1)
}
  0x75   : > { %1349 = dma.hbm_to_vmem [thread:$0]  (!%p2242_p11), %s2241_s4, 16, %s230_s11, [#allocation13]  }
  0x76   : > { %s1929_s8 = scalar_lea.hbm %s2205_s0, %s1853_s12  ;;  %s244_s17 = scalar_lea.vmem [#allocation6], %s1850_s30 }
  0x77   : > { %s252_s6 = sshll.u32 %s244_s17, 4  ;;  %s1938_s25 = scalar_lea.hbm %s2207_s2, %s1853_s12  ;;  %s1932_s6 = int_to_ptr.vmem [resolvable:$true] %s252_s6 }
  0x78   : > { %s2245_s10 = sand.u32 1, %s1684_s20   ;;  %s1546_s1 = scalar_lea.hbm %s1929_s8, 64 }
  0x79   : > { %s241_s11 = scalar_lea.sflag [#allocation7], %s2245_s10  ;;  %p1547_p3 = scmp.ne.s32.totalorder %s1929_s8, %s1546_s1 }
  0x7a   : > { %p2246_p7 = scmp.ne.s32.totalorder %s2240_s16, 0  ;;  %s1551_s7 = scalar_lea.hbm %s2205_s0, 128 }
  0x7b   : > { %p1552_p10 = scmp.lt.u32.totalorder %s1929_s8, %s2205_s0  ;;  %p1553_p6 = scmp.lt.u32.totalorder %s1551_s7, %s1546_s1 }
  0x7c   : > { %p1549_p11 = pnand %p1547_p3, %p2246_p7  ;;  %p1555_p12 = scmp.lt.u32.totalorder %s1546_s1, %s1929_s8 }
  0x7d   : > { %p1554_p8 = por %p1553_p6, %p1552_p10 }
  0x7e   : > { %p1550_p13 = pneg %p1549_p11 }
  0x7f   : > { %p1556_p0 = por %p1555_p12, %p1554_p8 }
  0x81   : > { %p1557_p5 = pnand %p1556_p0, %p1550_p13 }
  0x83   : > { %1560 = shalt.err (!%p1557_p5)
}
  0x84   : > { %s1561_s12 = scalar_lea.vmem %s1932_s6, 64  ;;  %s1703_s15 = smov [#allocation6]  }
  0x85   : > { %p1562_p9 = scmp.ne.s32.totalorder %s1932_s6, %s1561_s12  ;;  %s1566_s29 = sshll.u32 %s1703_s15, 4  ;;  %s1567_s29 = int_to_ptr.vmem [resolvable:$false] %s1566_s29 }
  0x86   : > { %s1568_s4 = scalar_lea.vmem %s1567_s29, 128  ;;  %p1569_p1 = scmp.lt.s32.totalorder %s1932_s6, %s1567_s29 }
  0x87   : > { %p1564_p2 = pnand %p1562_p9, %p2246_p7  ;;  %p1570_p3 = scmp.lt.s32.totalorder %s1568_s4, %s1561_s12 }
  0x89   : > { %p1565_p4 = pneg %p1564_p2  ;;  %p1571_p11 = por %p1570_p3, %p1569_p1 }
  0x8b   : > { %p1572_p10 = pnand %p1571_p11, %p1565_p4 }
  0x8d   : > { %1575 = shalt.err (!%p1572_p10)
}
  0x8e   : > { %p2247_p13 = scmp.ne.s32.totalorder %s2238_s14, 0  ;;  %s282_s10 = scalar_lea.vmem [#allocation11], %s1850_s30 }
  0x8f   : > { %s290_s1 = sshll.u32 %s282_s10, 4  ;;  %s1576_s13 = scalar_lea.hbm %s1938_s25, 64  ;;  %s291_s1 = int_to_ptr.vmem [resolvable:$true] %s290_s1 }
  0x90   : > { %1353 = dma.hbm_to_vmem [thread:$0]  (!%p2247_p13), %s1929_s8, 64, %s1932_s6, %s241_s11  }
  0x91   : > { %p1577_p6 = scmp.ne.s32.totalorder %s1938_s25, %s1576_s13  ;;  %s1581_s17 = scalar_lea.hbm %s2207_s2, 128 }
  0x92   : > { %p1582_p0 = scmp.lt.u32.totalorder %s1938_s25, %s2207_s2  ;;  %p1583_p5 = scmp.lt.u32.totalorder %s1581_s17, %s1576_s13 }
  0x93   : > { %p1579_p8 = pnand %p1577_p6, %p2246_p7  ;;  %p1585_p2 = scmp.lt.u32.totalorder %s1576_s13, %s1938_s25 }
  0x94   : > { %p1584_p9 = por %p1583_p5, %p1582_p0 }
  0x95   : > { %p1580_p12 = pneg %p1579_p8 }
  0x96   : > { %p1586_p4 = por %p1585_p2, %p1584_p9 }
  0x98   : > { %p1587_p1 = pnand %p1586_p4, %p1580_p12 }
  0x9a   : > { %1590 = shalt.err (!%p1587_p1)
}
  0x9b   : > { %s1591_s30 = scalar_lea.vmem %s291_s1, 64  ;;  %s1704_s8 = smov [#allocation11]  }
  0x9c   : > { %p1592_p3 = scmp.ne.s32.totalorder %s291_s1, %s1591_s30  ;;  %s1596_s6 = sshll.u32 %s1704_s8, 4  ;;  %s1597_s6 = int_to_ptr.vmem [resolvable:$false] %s1596_s6 }
  0x9d   : > { %s1598_s11 = scalar_lea.vmem %s1597_s6, 128  ;;  %p1599_p6 = scmp.lt.s32.totalorder %s291_s1, %s1597_s6 }
  0x9e   : > { %p1594_p11 = pnand %p1592_p3, %p2246_p7  ;;  %p1600_p8 = scmp.lt.s32.totalorder %s1598_s11, %s1591_s30 }
  0xa0   : > { %p1595_p10 = pneg %p1594_p11  ;;  %p1601_p13 = por %p1600_p8, %p1599_p6 }
  0xa2   : > { %p1602_p0 = pnand %p1601_p13, %p1595_p10 }
  0xa4   : > { %1605 = shalt.err (!%p1602_p0)
}
  0xa5   : > { %p2248_p5 = scmp.ne.s32.totalorder %s2238_s14, 0  ;;  %p2249_p12 = scmp.ne.s32.totalorder %s2231_s28, 0 }
  0xa6   : > { %s1985_s16 = sand.u32 (!%p2249_p12), 1, %s1680_s19   ;;  %p2250_p7 = scmp.ne.s32.totalorder (!%p2249_p12), %s2229_s26, 0 }
  0xa7   : > { %1359 = dma.hbm_to_vmem [thread:$0]  (!%p2248_p5), %s1938_s25, 64, %s291_s1, %s1874_s3  }
  0xa8   : > { %299 = sbr.rel (%p2249_p12) target bundleno = 1460 (0x5b4), region = 40  ;;  %s1988_s29 = sshll.u32 (!%p2249_p12), %s1985_s16, 2 }
  0xa9   : > { %s302_s4 = scalar_lea.sflag (!%p2249_p12), [#allocation7], %s1985_s16  ;;  %s305_s10 = scalar_lea.vmem (!%p2249_p12), [#allocation6], %s1988_s29 }
  0xaf   : > { %1659 = dma.done.wait (%p2250_p7), %s302_s4, 64  }
  0xb0   : > { %1661 = vsyncadd (%p2250_p7), %s302_s4, 4294967232  ;;  %s310_s3 = sand.u32 1, %s1777_s24   ;;  %s314_s14 = scalar_lea.vmem [#allocation9], %s1988_s29 }
  0xb1   : > { %s311_s28 = scalar_lea.sflag [#allocation10], %s310_s3 }
  0xb2   : > { %1663 = dma.done.wait (%p2250_p7), %s311_s28, 128  }
  0xb3   : > { %1665 = vsyncadd (%p2250_p7), %s311_s28, 4294967168  ;;  %s323_s25 = scalar_lea.vmem [#allocation11], %s1988_s29  ;;  %p2251_p13 = scmp.eq.s32.totalorder %s1777_s24, 0 }
  0xb5   : > { %1667 = dma.done.wait (%p2251_p13), [#allocation13], 272   ;;  %p2252_p9 = pmov %p2251_p13 }
  0xb6   : > { %v1705_v0 = vmov 0.0   ;;  %vm382_vm0 = vcmask 64512   ;;  %vm1706_vm1 = vmmov 0   ;;  %vm398_vm2 = vcmask 60416   ;;  %v387_v1 = vld [vmem:[%s305_s10] sm:$0xf] }
  0xb7   : > { %1669 = vsyncadd (%p2252_p9), [#allocation13], 4294967024  ;;  %1271 = vmatprep.subr.bf16.mxu0 %v1705_v0  ;;  %1277 = vmatprep.subr.bf16.mxu1 %v1705_v0  ;;  %383 = vst.msk [vmem:[#allocation4] sm:$0xff] %vm382_vm0, %v1705_v0  ;;  %v403_v2 = vld [vmem:[%s314_s14] sm:$0xf]  ;;  %s1707_s24 = smov 112  }
  0xb8   : > { %384 = vst.msk [vmem:[#allocation4 + $0x8] sm:$0xff] %vm382_vm0, %v1705_v0  ;;  %385 = vst.msk [vmem:[#allocation4 + $0x10] sm:$0xff] %vm382_vm0, %v1705_v0  ;;  %1273 = vmatprep.mubr.msk.bf16.mxu0 %vm1706_vm1, %v1705_v0  ;;  %1279 = vmatprep.mubr.msk.bf16.mxu1 %vm1706_vm1, %v1705_v0  ;;  %s1708_s26 = smov 120   ;;  %v428_v3 = vsel %vm382_vm0, %v403_v2, 0  ;;  %s1709_s1 = smov 104   ;;  %vm373_vm3 = vcmask 7168  }
  0xb9   : > { %386 = vst.msk [vmem:[#allocation4 + $0x18] sm:$0xff] %vm382_vm0, %v1705_v0  ;;  %392 = vrot.lane.b32.xlu1 %v387_v1, %s1707_s24  ;;  %389 = vrot.lane.b32.xlu0 %v387_v1, %s1708_s26  ;;  %v1710_v22 = vmov -inf   ;;  %v1711_v23 = vmov 0   ;;  %v411_v43 = vld [vmem:[%s323_s25] sm:$0xf]  ;;  %vm736_vm4 = vcmask 1043456  }
  0xba   : > { %399 = vst.msk [vmem:[#allocation5] sm:$0xf] %vm398_vm2, %v387_v1  ;;  %1272 = vmatpush3.bf16.xpose.msra.mxu0 %v428_v3  ;;  %1432 = vset.pattern.permute.xlu1 %v1711_v23  ;;  %v738_v44 = vsel %vm736_vm4, %v411_v43, 0  ;;  %s1712_s13 = smov 8   ;;  %s1713_s22 = smov 16   ;;  %vm982_vm5 = vcmask 130048  }
  0xbb   : > { %1283 = vmatprep.subr.bf16.mxu0 %v1705_v0  ;;  %374 = vst.msk [vmem:[#allocation2] sm:$0xff] %vm373_vm3, %v1710_v22  ;;  %375 = vst.msk [vmem:[#allocation2 + $0x8] sm:$0xff] %vm373_vm3, %v1710_v22  ;;  %1433 = vset.pattern.permute.xlu0 %v1711_v23  ;;  %s1714_s7 = smov 24   ;;  %vm984_vm6 = vcmask 195584   ;;  %vm1010_vm7 = vcmask 261120   ;;  %s1235_s17 = sshll.u32 %s1985_s16, 3 }
  0xbc   : > { %376 = vst.msk [vmem:[#allocation2 + $0x10] sm:$0xff] %vm373_vm3, %v1710_v22  ;;  %377 = vst.msk [vmem:[#allocation2 + $0x18] sm:$0xff] %vm373_vm3, %v1710_v22  ;;  %s1249_s12 = sshll.u32 %s1688_s21, 7  ;;  %s367_s15 = scalar_lea.vmem [#allocation15], %s1235_s17 }
  0xbd   : > { %407 = vrot.lane.b32.xlu1 %v403_v2, %s1707_s24  ;;  %405 = vrot.lane.b32.xlu0 %v403_v2, %s1708_s26  ;;  %378 = vst.msk [vmem:[#allocation3] sm:$0xff] %vm373_vm3, %v1705_v0  ;;  %379 = vst.msk [vmem:[#allocation3 + $0x8] sm:$0xff] %vm373_vm3, %v1705_v0  ;;  %s1070_s30 = sshll.u32 %s367_s15, 4  ;;  %s2156_s11 = scalar_lea.hbm %s2210_s5, %s1249_s12  ;;  %s2158_s30 = int_to_ptr.vmem [resolvable:$true] %s1070_s30 }
  0xbe   : > { %380 = vst.msk [vmem:[#allocation3 + $0x10] sm:$0xff] %vm373_vm3, %v1705_v0  ;;  %381 = vst.msk [vmem:[#allocation3 + $0x18] sm:$0xff] %vm373_vm3, %v1705_v0  ;;  %s1056_s29 = scalar_lea.sflag [#allocation8], %s1985_s16  ;;  %s1606_s21 = scalar_lea.vmem %s2158_s30, 128 }
  0xbf   : > { %p1607_p2 = scmp.ne.s32.totalorder %s2158_s30, %s1606_s21  ;;  %p2253_p4 = scmp.ne.s32.totalorder %s2236_s9, 0 }
  0xc0   : > { %s1715_s4 = smov [#allocation15]  }
  0xc1   : > { %v419_v4 = vld [vmem:[#allocation5] sm:$0xf]  ;;  %409 = vrot.lane.b32.xlu1 %v403_v2, %s1709_s1  ;;  %395 = vrot.lane.b32.xlu0 %v387_v1, %s1709_s1  ;;  %p1608_p1 = pnand %p1607_p2, %p2253_p4  ;;  %s1610_s10 = sshll.u32 %s1715_s4, 4  ;;  %s1611_s10 = int_to_ptr.vmem [resolvable:$false] %s1610_s10 }
  0xc2   : > { %1274 = vmatmul.mubr.msk.bf16.vlgmr.msra.gmra.mrb[0].mxu0 %vm382_vm0, %v419_v4  ;;  %v2070_v39 = vld [vmem:[#allocation2] sm:$0xff]  ;;  %v2084_v45 = vld [vmem:[#allocation2 + $0x8] sm:$0xff]  ;;  %s1612_s3 = scalar_lea.vmem %s1611_s10, 256  ;;  %p1613_p11 = scmp.lt.s32.totalorder %s2158_s30, %s1611_s10 }
  0xc3   : > { %1285 = vmatprep.mubr.msk.bf16.mxu0 %vm1706_vm1, %v1705_v0  ;;  %v2086_v46 = vld [vmem:[#allocation2 + $0x10] sm:$0xff]  ;;  %v2104_v53 = vld [vmem:[#allocation2 + $0x18] sm:$0xff]  ;;  %p1609_p3 = pneg %p1608_p1  ;;  %p1614_p10 = scmp.lt.s32.totalorder %s1612_s3, %s1606_s21 }
  0xc5   : > { %p1615_p6 = por %p1614_p10, %p1613_p11 }
  0xc7   : > { %p1616_p8 = pnand %p1615_p6, %p1609_p3 }
 0x12b   : > { %v393_v5 = vpop.permute.xlu1 %392  ;;  %v390_v6 = vpop.permute.xlu0 %389 }
 0x12c   : > { %401 = vst.msk [vmem:[#allocation5 + $0x8] sm:$0xf] %vm398_vm2, %v393_v5  ;;  %400 = vst.msk [vmem:[#allocation5 + $0x4] sm:$0xf] %vm398_vm2, %v390_v6 }
 0x12f   : > { %v408_v7 = vpop.permute.xlu1 %407  ;;  %v406_v8 = vpop.permute.xlu0 %405 }
 0x130   : > { %v520_v9 = vsel %vm382_vm0, %v408_v7, 0  ;;  %v474_v10 = vsel %vm382_vm0, %v406_v8, 0 }
 0x131   : > { %1278 = vmatpush3.bf16.xpose.msra.mxu1 %v474_v10  ;;  %1284 = vmatpush3.bf16.xpose.msra.mxu0 %v520_v9 }
 0x132   : > { %1289 = vmatprep.subr.bf16.mxu1 %v1705_v0  ;;  %1295 = vmatprep.subr.bf16.mxu0 %v1705_v0 }
 0x133   : > { %v410_v11 = vpop.permute.xlu1 %409  ;;  %v396_v12 = vpop.permute.xlu0 %395  ;;  %v421_v13 = vld [vmem:[#allocation5 + $0x8] sm:$0xf]  ;;  %v420_v15 = vld [vmem:[#allocation5 + $0x4] sm:$0xf] }
 0x134   : > { %402 = vst.msk [vmem:[#allocation5 + $0xc] sm:$0xf] %vm398_vm2, %v396_v12  ;;  %v566_v14 = vsel %vm382_vm0, %v410_v11, 0 }
 0x138   : > { %1280 = vmatmul.mubr.msk.bf16.vlgmr.msra.gmra.mrb[0].mxu1 %vm382_vm0, %v420_v15  ;;  %1286 = vmatmul.mubr.msk.bf16.vlgmr.msra.gmra.mrb[4].mxu0 %vm382_vm0, %v421_v13 }
 0x139   : > { %1290 = vmatpush3.bf16.xpose.msra.mxu1 %v566_v14  ;;  %1291 = vmatprep.mubr.msk.bf16.mxu1 %vm1706_vm1, %v1705_v0 }
 0x13a   : > { %1297 = vmatprep.mubr.msk.bf16.mxu0 %vm1706_vm1, %v1705_v0  ;;  %1301 = vmatprep.subr.bf16.mxu1 %v1705_v0 }
 0x13b   : > { %v422_v16 = vld [vmem:[#allocation5 + $0xc] sm:$0xf]  ;;  %1296 = vmatpush3.bf16.msra.mxu0 %v738_v44 }
 0x13c   : > { %1307 = vmatprep.subr.bf16.mxu0 %v1705_v0 }
 0x140   : > { %1292 = vmatmul.mubr.msk.bf16.vlgmr.msra.gmra.mrb[4].mxu1 %vm382_vm0, %v422_v16 }
 0x141   : > { %1303 = vmatprep.mubr.msk.bf16.mxu1 %vm1706_vm1, %v1705_v0 }
 0x195   : > { %v2051_v17 = vpop.f32.mrb[0].mxu0 }
 0x196   : > { %v612_v18 = vsel %vm382_vm0, %v2051_v17, -inf  ;;  %v1275_v19 = vpop.f32.mrb[1].mxu0 }
 0x197   : > { %613 = vmax.xlane.f32.xlu0 %v612_v18  ;;  %v467_v20 = vpop.f32.mrb[2].mxu0 }
 0x198   : > { %v1276_v21 = vpop.f32.mrb[3].mxu0 }
 0x20b   : > { %v510_v24 = vpop.f32.mrb[0].mxu1  ;;  %v556_v25 = vpop.f32.mrb[4].mxu0 }
 0x20c   : > { %v1281_v26 = vpop.f32.mrb[1].mxu1  ;;  %v1287_v27 = vpop.f32.mrb[5].mxu0  ;;  %v615_v28 = vsel %vm382_vm0, %v510_v24, -inf  ;;  %v618_v29 = vsel %vm382_vm0, %v556_v25, -inf }
 0x20d   : > { %616 = vmax.xlane.f32.xlu1 %v615_v28  ;;  %v513_v30 = vpop.f32.mrb[2].mxu1  ;;  %619 = vmax.xlane.f32.xlu0 %v618_v29  ;;  %v559_v31 = vpop.f32.mrb[6].mxu0 }
 0x20e   : > { %v1282_v32 = vpop.f32.mrb[3].mxu1  ;;  %v1288_v33 = vpop.f32.mrb[7].mxu0 }
 0x213   : > { %v602_v34 = vpop.f32.mrb[4].mxu1 }
 0x214   : > { %v1293_v35 = vpop.f32.mrb[5].mxu1  ;;  %v621_v36 = vsel %vm382_vm0, %v602_v34, -inf }
 0x215   : > { %v605_v37 = vpop.f32.mrb[6].mxu1  ;;  %622 = vmax.xlane.f32.xlu0 %v621_v36  ;;  %v673_v35 = vld [vmem:[#allocation3 + $0x8] sm:$0xff]  ;;  %v674_v36 = vld [vmem:[#allocation3 + $0x10] sm:$0xff] }
 0x216   : > { %v1294_v38 = vpop.f32.mrb[7].mxu1 }
 0x224   : > { %v614_v40 = vpop.xlane.xlu0 %613 }
 0x225   : > { %v2073_v41 = vmax.f32 %v2070_v39, %v614_v40 }
 0x227   : > { %v628_v42 = vsub.f32 %v2070_v39, %v2073_v41  ;;  %926 = vst.msk [vmem:[#allocation2] sm:$0xff] %vm373_vm3, %v2073_v41  ;;  %642 = vperm.xlu1 %1432, %v2073_v41  }
 0x29a   : > { %v617_v47 = vpop.xlane.xlu1 %616  ;;  %v620_v48 = vpop.xlane.xlu0 %619 }
 0x29b   : > { %v2089_v49 = vmax.f32 %v2084_v45, %v617_v47  ;;  %v2092_v50 = vmax.f32 %v2086_v46, %v620_v48 }
 0x29d   : > { %v629_v51 = vsub.f32 %v2084_v45, %v2089_v49  ;;  %927 = vst.msk [vmem:[#allocation2 + $0x8] sm:$0xff] %vm373_vm3, %v2089_v49  ;;  %v630_v52 = vsub.f32 %v2086_v46, %v2092_v50  ;;  %928 = vst.msk [vmem:[#allocation2 + $0x10] sm:$0xff] %vm373_vm3, %v2092_v50  ;;  %647 = vperm.xlu0 %1433, %v2089_v49   ;;  %652 = vperm.xlu1 %1432, %v2092_v50   ;;  %v675_v46 = vld [vmem:[#allocation3 + $0x18] sm:$0xff]  ;;  %v672_v50 = vld [vmem:[#allocation3] sm:$0xff] }
 0x29f   : > { %v634_v23 = vmul.f32 1.442695, %v629_v51 }
 0x2a2   : > { %v623_v54 = vpop.xlane.xlu0 %622 }
 0x2a3   : > { %v627_v55 = vmax.f32 %v2104_v53, %v623_v54 }
 0x2a5   : > { %v631_v56 = vsub.f32 %v2104_v53, %v627_v55  ;;  %929 = vst.msk [vmem:[#allocation2 + $0x18] sm:$0xff] %vm373_vm3, %v627_v55  ;;  %657 = vperm.xlu1 %1432, %v627_v55  }
 0x2a6   : > { %v643_v57 = vpop.permute.xlu1 %642 }
 0x2a7   : > { %v660_v58 = vsub.f32 %v2051_v17, %v643_v57  ;;  %v638_v26 = vmul.f32 1.442695, %v631_v56 }
 0x2a9   : > { %v664_v59 = vmul.f32 1.442695, %v660_v58  ;;  %413 = vrot.lane.b32.xlu1 %v411_v43, %s1708_s26 }
 0x2ab   : > { %1436 = vpow2.f32 %v664_v59 }
 0x2ad   : > { %415 = vrot.lane.b32.xlu1 %v411_v43, %s1707_s24 }
 0x2b1   : > { %417 = vrot.lane.b32.xlu1 %v411_v43, %s1709_s1 }
 0x2b5   : > { %v1437_v60 = vpop.eup %1436 }
 0x2b6   : > { %v729_v61 = vpack.c.bf16 %v1437_v60, %v1437_v60 }
 0x2b8   : > { %1298 = vmatmul.mubr.msk.bf16.vlgmr.msra.gmra.mrb[8].mxu0 %vm382_vm0, %v729_v61 }
 0x2b9   : > { %1309 = vmatprep.mubr.msk.bf16.mxu0 %vm1706_vm1, %v1705_v0 }
 0x31c   : > { %v648_v62 = vpop.permute.xlu0 %647  ;;  %v653_v63 = vpop.permute.xlu1 %652 }
 0x31d   : > { %v661_v1 = vsub.f32 %v510_v24, %v648_v62  ;;  %v662_v2 = vsub.f32 %v556_v25, %v653_v63  ;;  %v680_v24 = vsel %vm382_vm0, %v1437_v60, 0.0  ;;  %v636_v25 = vmul.f32 1.442695, %v630_v52  ;;  %v702_v60 = vld [vmem:[#allocation4 + $0x8] sm:$0xff] }
 0x31f   : > { %v666_v3 = vmul.f32 1.442695, %v661_v1  ;;  %v668_v4 = vmul.f32 1.442695, %v662_v2  ;;  %v703_v1 = vld [vmem:[#allocation4 + $0x10] sm:$0xff] }
 0x321   : > { %1438 = vpow2.f32 %v666_v3 }
 0x322   : > { %1440 = vpow2.f32 %v668_v4 }
 0x324   : > { %v658_v5 = vpop.permute.xlu1 %657 }
 0x325   : > { %v663_v6 = vsub.f32 %v602_v34, %v658_v5  ;;  %v632_v34 = vmul.f32 1.442695, %v628_v42 }
 0x327   : > { %v670_v7 = vmul.f32 1.442695, %v663_v6 }
 0x328   : > { %v414_v8 = vpop.permute.xlu1 %413 }
 0x329   : > { %1442 = vpow2.f32 %v670_v7  ;;  %v784_v9 = vsel %vm736_vm4, %v414_v8, 0  ;;  %v704_v8 = vld [vmem:[#allocation4 + $0x18] sm:$0xff] }
 0x32a   : > { %1302 = vmatpush3.bf16.msra.mxu1 %v784_v9  ;;  %1444 = vpow2.f32 %v634_v23 }
 0x32b   : > { %v1439_v10 = vpop.eup %1438  ;;  %1313 = vmatprep.subr.bf16.mxu1 %v1705_v0  ;;  %1446 = vpow2.f32 %v636_v25 }
 0x32c   : > { %v1441_v11 = vpop.eup %1440  ;;  %v416_v12 = vpop.permute.xlu1 %415  ;;  %v683_v13 = vsel %vm382_vm0, %v1439_v10, 0.0  ;;  %v730_v14 = vpack.c.bf16 %v1439_v10, %v1439_v10  ;;  %1448 = vpow2.f32 %v638_v26 }
 0x32d   : > { %v830_v15 = vsel %vm736_vm4, %v416_v12, 0  ;;  %684 = vadd.xlane.f32.xlu1 %v683_v13  ;;  %v686_v16 = vsel %vm382_vm0, %v1441_v11, 0.0  ;;  %v731_v17 = vpack.c.bf16 %v1441_v11, %v1441_v11  ;;  %1450 = vpow2.f32 %v632_v34 }
 0x32e   : > { %687 = vadd.xlane.f32.xlu0 %v686_v16  ;;  %1304 = vmatmul.mubr.msk.bf16.vlgmr.msra.gmra.mrb[8].mxu1 %vm382_vm0, %v730_v14 }
 0x32f   : > { %1308 = vmatpush3.bf16.msra.mxu0 %v830_v15  ;;  %1315 = vmatprep.mubr.msk.bf16.mxu1 %vm1706_vm1, %v1705_v0 }
 0x330   : > { %v418_v18 = vpop.permute.xlu1 %417  ;;  %1319 = vmatprep.subr.bf16.mxu0 %v1705_v0 }
 0x331   : > { %v876_v19 = vsel %vm736_vm4, %v418_v18, 0 }
 0x332   : > { %1310 = vmatmul.mubr.msk.bf16.vlgmr.msra.gmra.mrb[12].mxu0 %vm382_vm0, %v731_v17  ;;  %1314 = vmatpush3.bf16.msra.mxu1 %v876_v19 }
 0x333   : > { %v1443_v20 = vpop.eup %1442  ;;  %1323 = vmatprep.mubr.msk.bf16.mxu0 %vm1706_vm1, %v1705_v0 }
 0x334   : > { %v689_v21 = vsel %vm382_vm0, %v1443_v20, 0.0  ;;  %v732_v22 = vpack.c.bf16 %v1443_v20, %v1443_v20  ;;  %v1445_v27 = vpop.eup %1444 }
 0x335   : > { %690 = vadd.xlane.f32.xlu1 %v689_v21  ;;  %v1447_v28 = vpop.eup %1446  ;;  %v677_v37 = vmul.f32 %v1445_v27, %v673_v35  ;;  %v1434_v21 = vld [vmem:[#allocation12] sm:$0xff]  }
 0x336   : > { %1316 = vmatmul.mubr.msk.bf16.vlgmr.msra.gmra.mrb[12].mxu1 %vm382_vm0, %v732_v22  ;;  %v1449_v29 = vpop.eup %1448  ;;  %v678_v38 = vmul.f32 %v1447_v28, %v674_v36  ;;  %1320 = vmatpush3.bf16.msra.mxu0 %v1434_v21  ;;  %v1435_v22 = vld [vmem:[#allocation12 + $0x8] sm:$0xff]  }
 0x337   : > { %v679_v47 = vmul.f32 %v1449_v29, %v675_v46  ;;  %v1451_v48 = vpop.eup %1450  ;;  %1321 = vmatprep.subr.bf16.mxu0 %v1705_v0 }
 0x338   : > { %v676_v42 = vmul.f32 %v1451_v48, %v672_v50 }
 0x339   : > { %681 = vadd.xlane.f32.xlu1 %v680_v24 }
 0x33a   : > { %1322 = vmatpush3.bf16.msra.mxu0 %v1435_v22 }
 0x344   : > { %712 = vperm.xlu0 %1433, %v1445_v27  }
 0x34a   : > { %717 = vperm.xlu1 %1432, %v1447_v28  }
 0x34e   : > { %722 = vperm.xlu1 %1432, %v1449_v29   ;;  %v701_v29 = vld [vmem:[#allocation4] sm:$0xff] }
 0x38b   : > { %v2135_v30 = vpop.f32.mrb[8].mxu0 }
 0x38c   : > { %v1299_v31 = vpop.f32.mrb[9].mxu0 }
 0x38d   : > { %v777_v32 = vpop.f32.mrb[10].mxu0 }
 0x38e   : > { %v1300_v33 = vpop.f32.mrb[11].mxu0 }
 0x3ba   : > { %v685_v40 = vpop.xlane.xlu1 %684 }
 0x3bb   : > { %v688_v43 = vpop.xlane.xlu0 %687  ;;  %v693_v44 = vadd.f32 %v685_v40, %v677_v37 }
 0x3bc   : > { %v694_v45 = vadd.f32 %v688_v43, %v678_v38 }
 0x3bd   : > { %698 = vst.msk [vmem:[#allocation3 + $0x8] sm:$0xff] %vm373_vm3, %v693_v44 }
 0x3be   : > { %699 = vst.msk [vmem:[#allocation3 + $0x10] sm:$0xff] %vm373_vm3, %v694_v45 }
 0x3c2   : > { %v691_v49 = vpop.xlane.xlu1 %690 }
 0x3c3   : > { %v695_v39 = vadd.f32 %v691_v49, %v679_v47  ;;  %v713_v61 = vpop.permute.xlu0 %712 }
 0x3c4   : > { %v934_v41 = vld [vmem:[#allocation3 + $0x8] sm:$0xff]  ;;  %v726_v63 = vmul.f32 %v713_v61, %v702_v60 }
 0x3c5   : > { %700 = vst.msk [vmem:[#allocation3 + $0x18] sm:$0xff] %vm373_vm3, %v695_v39  ;;  %v935_v51 = vld [vmem:[#allocation3 + $0x10] sm:$0xff]  ;;  %1452 = vrcp.f32 %v934_v41 }
 0x3c6   : > { %v682_v52 = vpop.xlane.xlu1 %681  ;;  %1454 = vrcp.f32 %v935_v51 }
 0x3c7   : > { %v692_v53 = vadd.f32 %v682_v52, %v676_v42 }
 0x3c9   : > { %697 = vst.msk [vmem:[#allocation3] sm:$0xff] %vm373_vm3, %v692_v53 }
 0x3ca   : > { %v718_v62 = vpop.permute.xlu1 %717 }
 0x3cb   : > { %v727_v6 = vmul.f32 %v718_v62, %v703_v1 }
 0x3cc   : > { %v936_v54 = vld [vmem:[#allocation3 + $0x18] sm:$0xff] }
 0x3cd   : > { %1456 = vrcp.f32 %v936_v54 }
 0x3ce   : > { %v723_v9 = vpop.permute.xlu1 %722 }
 0x3cf   : > { %v1453_v55 = vpop.eup %1452  ;;  %v728_v14 = vmul.f32 %v723_v9, %v704_v8 }
 0x3d0   : > { %v1455_v56 = vpop.eup %1454  ;;  %952 = vperm.xlu0 %1433, %v1453_v55   ;;  %v933_v57 = vld [vmem:[#allocation3] sm:$0xff] }
 0x3d1   : > { %957 = vperm.xlu1 %1432, %v1455_v56   ;;  %1458 = vrcp.f32 %v933_v57 }
 0x3d5   : > { %707 = vperm.xlu1 %1432, %v1451_v48   ;;  %v1244_v48 = vld [vmem:[#allocation14] ss:$0 sm:$0xff] }
 0x3d7   : > { %v1457_v58 = vpop.eup %1456 }
 0x3d8   : > { %962 = vperm.xlu0 %1433, %v1457_v58  }
 0x3db   : > { %v1459_v59 = vpop.eup %1458 }
 0x3dc   : > { %947 = vperm.xlu0 %1433, %v1459_v59  }
 0x401   : > { %v820_v2 = vpop.f32.mrb[8].mxu1 }
 0x402   : > { %v919_v3 = vadd.f32 %v820_v2, %v726_v63  ;;  %v1305_v4 = vpop.f32.mrb[9].mxu1 }
 0x403   : > { %v823_v5 = vpop.f32.mrb[10].mxu1 }
 0x404   : > { %923 = vst.msk [vmem:[#allocation4 + $0x8] sm:$0xff] %vm382_vm0, %v919_v3  ;;  %v1306_v7 = vpop.f32.mrb[11].mxu1 }
 0x405   : > { %v866_v10 = vpop.f32.mrb[12].mxu0 }
 0x406   : > { %v920_v11 = vadd.f32 %v866_v10, %v727_v6  ;;  %v1311_v12 = vpop.f32.mrb[13].mxu0 }
 0x407   : > { %v869_v13 = vpop.f32.mrb[14].mxu0 }
 0x408   : > { %924 = vst.msk [vmem:[#allocation4 + $0x10] sm:$0xff] %vm382_vm0, %v920_v11  ;;  %v1312_v15 = vpop.f32.mrb[15].mxu0 }
 0x409   : > { %v912_v16 = vpop.f32.mrb[12].mxu1 }
 0x40a   : > { %v921_v17 = vadd.f32 %v912_v16, %v728_v14  ;;  %v1317_v18 = vpop.f32.mrb[13].mxu1 }
 0x40b   : > { %v915_v19 = vpop.f32.mrb[14].mxu1  ;;  %v942_v23 = vld [vmem:[#allocation4 + $0x8] sm:$0xff] }
 0x40c   : > { %925 = vst.msk [vmem:[#allocation4 + $0x18] sm:$0xff] %vm382_vm0, %v921_v17  ;;  %v1318_v20 = vpop.f32.mrb[15].mxu1 }
 0x40f   : > { %v943_v26 = vld [vmem:[#allocation4 + $0x10] sm:$0xff] }
 0x413   : > { %v944_v35 = vld [vmem:[#allocation4 + $0x18] sm:$0xff] }
 0x44f   : > { %v953_v24 = vpop.permute.xlu0 %952 }
 0x450   : > { %v966_v25 = vmul.f32 %v953_v24, %v942_v23  ;;  %v958_v27 = vpop.permute.xlu1 %957 }
 0x451   : > { %v967_v28 = vmul.f32 %v958_v27, %v943_v26 }
 0x452   : > { %970 = vrot.lane.b32.xlu1 %v966_v25, %s1712_s13 }
 0x453   : > { %974 = vrot.lane.b32.xlu0 %v967_v28, %s1713_s22 }
 0x454   : > { %v708_v31 = vpop.permute.xlu1 %707 }
 0x455   : > { %v725_v32 = vmul.f32 %v708_v31, %v701_v29 }
 0x457   : > { %v918_v33 = vadd.f32 %v2135_v30, %v725_v32  ;;  %v963_v34 = vpop.permute.xlu0 %962 }
 0x458   : > { %v968_v0 = vmul.f32 %v963_v34, %v944_v35 }
 0x459   : > { %922 = vst.msk [vmem:[#allocation4] sm:$0xff] %vm382_vm0, %v918_v33 }
 0x45a   : > { %978 = vrot.lane.b32.xlu1 %v968_v0, %s1714_s7 }
 0x45b   : > { %v948_v37 = vpop.permute.xlu0 %947 }
 0x460   : > { %v941_v36 = vld [vmem:[#allocation4] sm:$0xff] }
 0x461   : > { %v965_v40 = vmul.f32 %v948_v37, %v941_v36 }
 0x4c4   : > { %v971_v38 = vpop.permute.xlu1 %970 }
 0x4c5   : > { %v981_v43 = vsel %vm382_vm0, %v965_v40, %v971_v38  ;;  %v975_v44 = vpop.permute.xlu0 %974 }
 0x4c6   : > { %v983_v45 = vsel %vm982_vm5, %v981_v43, %v975_v44 }
 0x4cc   : > { %v979_v30 = vpop.permute.xlu1 %978 }
 0x4cd   : > { %v985_v46 = vsel %vm984_vm6, %v983_v45, %v979_v30 }
 0x4ce   : > { %v986_v47 = vpack.c.bf16 %v985_v46, %v985_v46 }
 0x4d0   : > { %1324 = vmatmul.mubr.msk.bf16.vlgmr.msra.gmra.mrb[16].mxu0 %vm1010_vm7, %v986_v47 }
 0x5a3   : > { %v1048_v49 = vpop.f32.mrb[16].mxu0 }
 0x5a4   : > { %v1049_v50 = vadd.f32 %v1244_v48, %v1048_v49  ;;  %v1325_v39 = vpop.f32.mrb[17].mxu0 }
 0x5a5   : > { %v1051_v41 = vpop.f32.mrb[18].mxu0 }
 0x5a6   : > { %v1326_v42 = vpop.f32.mrb[19].mxu0  ;;  %1054 = vst.msk [vmem:[%s367_s15] sm:$0xff] %vm1010_vm7, %v1049_v50 }
 0x5a7   : > { %1619 = shalt.err (!%p1616_p8)
}
 0x5a8   : > { %s1620_s16 = scalar_lea.hbm %s2156_s11, 128  ;;  %s1624_s25 = scalar_lea.hbm %s2210_s5, 256 }
 0x5a9   : > { %p1621_p0 = scmp.ne.s32.totalorder %s2156_s11, %s1620_s16  ;;  %p1625_p7 = scmp.lt.u32.totalorder %s2156_s11, %s2210_s5 }
 0x5aa   : > { %p1626_p13 = scmp.lt.u32.totalorder %s1624_s25, %s1620_s16  ;;  %p1628_p2 = scmp.lt.u32.totalorder %s1620_s16, %s2156_s11 }
 0x5ab   : > { %p1622_p5 = pnand %p1621_p0, %p2253_p4 }
 0x5ac   : > { %p1627_p9 = por %p1626_p13, %p1625_p7 }
 0x5ad   : > { %p1623_p12 = pneg %p1622_p5 }
 0x5ae   : > { %p1629_p1 = por %p1628_p2, %p1627_p9 }
 0x5b0   : > { %p1630_p3 = pnand %p1629_p1, %p1623_p12 }
 0x5b2   : > { %1633 = shalt.err (!%p1630_p3)
}
 0x5b3   : > { %1341 = dma.vmem_to_hbm [thread:$0]  (%p2253_p4), %s2158_s30, 128, %s2156_s11, %s1056_s29  }
 0x5b4 PF: > { %s1082_s1 = sand.u32 1, %s1676_s18   ;;  %p2254_p11 = scmp.ne.s32.totalorder %s2230_s27, 0 }
 0x5b5   : > { %p2255_p10 = scmp.ge.s32.totalorder %s1696_s23, 2  ;;  %s1083_s13 = scalar_lea.sflag [#allocation8], %s1082_s1 }
 0x5b7   : > { %p1361_p6 = pnand %p2255_p10, %p2254_p11 }
 0x5b9   : > { %1671 = dma.done.wait (!%p1361_p6), %s1083_s13, 128  }
 0x5ba   : > { %1673 = vsyncadd (!%p1361_p6), %s1083_s13, 4294967168  ;;  %s25_s23 = sadd.s32 1, %s1696_s23   ;;  %s2256_s9 = sld [smem:[#allocation22_spill]] }
 0x5bb   : > { %p22_p8 = scmp.ge.s32.totalorder %s25_s23, 4   ;;  %s2257_s21 = sld [smem:[#allocation20_spill]] }
 0x5bc   : > { %s2258_s22 = sld [smem:[#allocation21_spill]]  ;;  %s2259_s18 = smov %s1680_s19 }
 0x5bd   : > { %s2260_s19 = smov %s1684_s20  ;;  %24 = sbr.rel (!%p22_p8) target bundleno = 13 (0xd), region = 125 }
 0x5c0   : > { %s2261_s20 = smov %s2256_s9 }
 0x5c4   :  { %1088 = vsyncpa [#allocation7], 1 }
 0x5c5   :  { %1090 = vsyncpa [#allocation7 + $0x1], 1 }
 0x5c6   :  { %1091 = vsyncpa [#allocation10], 1 }
 0x5c7   :  { %1093 = vsyncpa [#allocation10 + $0x1], 1 }
 0x5c8   :  { %1094 = vsyncpa [#allocation13], 1 }
 0x5c9   :  { %1095 = vsyncpa [#allocation8], 1 }
 0x5ca   :  { %1097 = vsyncpa [#allocation8 + $0x1], 1 }

</bundles_post_ra>
